<compile_context>
chip_gen: v7x
topology: tpu7x:2x2x1
jax: 0.10.0
libtpu: 0.0.40
codegen_flags: <defaults>
</compile_context>

<pallas_src>
import functools

import jax
import jax.numpy as jnp
from jax.experimental import pallas as pl
from jax.experimental.pallas import tpu as pltpu


def _round_up(n, m):
    return ((n + m - 1) // m) * m


# ---------------------- fused dual-LSTM + scoring kernel ----------------------

def _dual_encoder_kernel(xc_ref, xr_ref, wih_ref, whh_ref, b_ref, m_ref,
                         out_ref, h_scr, c_scr, xw_scr,
                         *, batch_pad, seq_len, mask_tail, unroll):
    # xc_ref/xr_ref : (TS*Bp, E)       bf16  time-major chunk (ctx / rsp)
    # wih_ref       : (E, 4*Hp)        bf16  gate order i,f,o,g (per-gate padded)
    # whh_ref       : (Hp, 4*Hp)       bf16
    # b_ref         : (1, 4*Hp)        f32   b_ih + b_hh
    # m_ref         : (Hp, Hp)         bf16
    # out_ref       : (Bp, Hp)         f32   lane-dense (ctx_h @ M) * rsp_h
    # h_scr/c_scr   : (2*Bp, Hp)       f32   LSTM state, carried across chunks
    # xw_scr        : (TS, 2*Bp, 4*Hp) f32   precomputed x @ W_ih + bias
    Bp = batch_pad
    rows, _ = xc_ref.shape
    TS = rows // Bp
    Hp = whh_ref.shape[0]
    chunk = pl.program_id(0)

    @pl.when(chunk == 0)
    def _():
        h_scr[...] = jnp.zeros_like(h_scr)
        c_scr[...] = jnp.zeros_like(c_scr)

    # ---- hoisted input projection: one batched matmul per encoder per chunk.
    bias = b_ref[...]                                      # (1, 4*Hp) f32
    w_ih = wih_ref[...]                                    # used once, pre-loop
    xw_c = jnp.dot(xc_ref[...], w_ih,
                   preferred_element_type=jnp.float32) + bias
    xw_r = jnp.dot(xr_ref[...], w_ih,
                   preferred_element_type=jnp.float32) + bias
    xw_scr[:, :Bp, :] = xw_c.reshape(TS, Bp, 4 * Hp)       # ctx rows
    xw_scr[:, Bp:, :] = xw_r.reshape(TS, Bp, 4 * Hp)       # rsp rows

    # ---- serial recurrence over this chunk: only h @ W_hh + gate math.
    def step(t, carry):
        h, c = carry                                       # (2*Bp, Hp) f32
        gates = xw_scr[t] + jnp.dot(h.astype(whh_ref.dtype), whh_ref[...],
                                    preferred_element_type=jnp.float32)
        ifo = jax.nn.sigmoid(gates[:, :3 * Hp])            # i,f,o contiguous
        g = jnp.tanh(gates[:, 3 * Hp:])
        c_new = ifo[:, Hp:2 * Hp] * c + ifo[:, :Hp] * g
        h_new = ifo[:, 2 * Hp:] * jnp.tanh(c_new)
        if mask_tail:                                      # padded tail steps
            valid = (chunk * TS + t) < seq_len
            h_new = jnp.where(valid, h_new, h)
            c_new = jnp.where(valid, c_new, c)
        return h_new, c_new

    h_last, c_last = jax.lax.fori_loop(0, TS, step, (h_scr[...], c_scr[...]),
                                       unroll=unroll)
    h_scr[...] = h_last
    c_scr[...] = c_last

    # ---- scoring head: only on the last chunk.
    @pl.when(chunk == pl.num_programs(0) - 1)
    def _():
        ctx_h = h_last[:Bp]
        rsp_h = h_last[Bp:]
        cm = jnp.dot(ctx_h.astype(m_ref.dtype), m_ref[...],
                     preferred_element_type=jnp.float32)
        out_ref[...] = cm * rsp_h                          # reduced in wrapper


# --------------------------------- wrapper ------------------------------------

_GATE_PERM = (0, 1, 3, 2)   # PyTorch order i,f,g,o -> kernel order i,f,o,g


def _pack_gates(w, h, h_pad):
    """(rows, 4*h) gate order i,f,g,o -> (rows, 4*h_pad) gate order i,f,o,g."""
    rows = w.shape[0]
    w4 = w.reshape(rows, 4, h)[:, _GATE_PERM, :]
    w4 = jnp.pad(w4, ((0, 0), (0, 0), (0, h_pad - h)))
    return w4.reshape(rows, 4 * h_pad)


def dual_encoder_forward(params, context_tokens, response_tokens):
    emb = params["embedding"].astype(jnp.bfloat16)
    B, S = context_tokens.shape
    E = emb.shape[1]
    H = params["M"].shape[0]

    Bp = _round_up(B, 8)          # sublane alignment (batch)
    Hp = _round_up(H, 128)        # lane alignment (per-gate vreg slices)
    TS = min(S, 64)               # time-chunk: bounds VMEM, enables pipelining
    Sp = _round_up(S, TS)
    n_chunks = Sp // TS

    # Embedding lookup emitted directly time-major (S, B, E) in bf16; padded
    # only along time (chunk multiple) and batch (sublane multiple), E untouched.
    def prep(tokens):
        x = jnp.take(emb, tokens.T, axis=0)                    # (S, B, E) bf16
        x = jnp.pad(x, ((0, Sp - S), (0, Bp - B), (0, 0)))     # (Sp, Bp, E)
        return x.reshape(Sp * Bp, E)                           # chunk-contiguous

    xc = prep(context_tokens)
    xr = prep(response_tokens)

    w_ih = _pack_gates(params["w_ih"], H, Hp).astype(jnp.bfloat16)       # (E, 4Hp)
    w_hh = jnp.pad(_pack_gates(params["w_hh"], H, Hp),
                   ((0, Hp - H), (0, 0))).astype(jnp.bfloat16)           # (Hp, 4Hp)
    bias = _pack_gates(params["bias"], H, Hp)                            # (1, 4Hp) f32
    m_pad = jnp.pad(params["M"], ((0, Hp - H), (0, Hp - H))).astype(jnp.bfloat16)

    kernel = functools.partial(_dual_encoder_kernel, batch_pad=Bp, seq_len=S,
                               mask_tail=(Sp != S), unroll=min(8, TS))

    prod = pl.pallas_call(
        kernel,
        out_shape=jax.ShapeDtypeStruct((Bp, Hp), jnp.float32),
        grid=(n_chunks,),
        in_specs=[
            pl.BlockSpec((TS * Bp, E), lambda s: (s, 0)),
            pl.BlockSpec((TS * Bp, E), lambda s: (s, 0)),
            pl.BlockSpec((E, 4 * Hp), lambda s: (0, 0)),
            pl.BlockSpec((Hp, 4 * Hp), lambda s: (0, 0)),
            pl.BlockSpec((1, 4 * Hp), lambda s: (0, 0)),
            pl.BlockSpec((Hp, Hp), lambda s: (0, 0)),
        ],
        out_specs=pl.BlockSpec((Bp, Hp), lambda s: (0, 0)),
        scratch_shapes=[
            pltpu.VMEM((2 * Bp, Hp), jnp.float32),            # h carry
            pltpu.VMEM((2 * Bp, Hp), jnp.float32),            # c carry
            pltpu.VMEM((TS, 2 * Bp, 4 * Hp), jnp.float32),    # x @ W_ih + b slab
        ],
        compiler_params=pltpu.CompilerParams(
            dimension_semantics=("arbitrary",),
            vmem_limit_bytes=32 * 1024 * 1024),
    )(xc, xr, w_ih, w_hh, bias, m_pad)

    # Padded gate columns stay exactly zero through the recurrence, so the
    # full-row sum equals the logical score:
    #   score_b = sum_h (ctx_h @ M)[b, h] * rsp_h[b, h]
    return jnp.sum(prod[:B], axis=-1, keepdims=True)


# --------------------------- pure-JAX f32 reference ---------------------------

def _reference_forward(params, context_tokens, response_tokens):
    emb = params["embedding"]
    H = params["M"].shape[0]

    def encode(tokens):
        x = jnp.take(emb, tokens, axis=0)                  # (B, S, E) f32
        bsz = x.shape[0]

        def step(carry, x_t):
            h, c = carry
            gates = x_t @ params["w_ih"] + h @ params["w_hh"] + params["bias"]
            i = jax.nn.sigmoid(gates[:, 0 * H:1 * H])
            f = jax.nn.sigmoid(gates[:, 1 * H:2 * H])
            g = jnp.tanh(gates[:, 2 * H:3 * H])
            o = jax.nn.sigmoid(gates[:, 3 * H:4 * H])
            c = f * c + i * g
            h = o * jnp.tanh(c)
            return (h, c), None

        init = (jnp.zeros((bsz, H), jnp.float32), jnp.zeros((bsz, H), jnp.float32))
        (h, _), _ = jax.lax.scan(step, init, jnp.swapaxes(x, 0, 1))
        return h

    ctx_h = encode(context_tokens)
    rsp_h = encode(response_tokens)
    return jnp.sum((ctx_h @ params["M"]) * rsp_h, axis=-1, keepdims=True)


# --------------------------------- params -------------------------------------

def init_params(key, vocab, emb_dim, hidden):
    k_emb, k_wih, k_whh, k_bih, k_bhh, k_m = jax.random.split(key, 6)
    bound = 1.0 / jnp.sqrt(hidden)                    # PyTorch LSTM default init
    xavier_std = jnp.sqrt(2.0 / (hidden + hidden))    # init.xavier_normal on M
    return {
        "embedding": jax.random.normal(k_emb, (vocab, emb_dim), jnp.float32),
        # stored pre-transposed: (E, 4H) / (H, 4H), PyTorch gate order i,f,g,o
        "w_ih": jax.random.uniform(k_wih, (emb_dim, 4 * hidden), jnp.float32,
                                   -bound, bound),
        "w_hh": jax.random.uniform(k_whh, (hidden, 4 * hidden), jnp.float32,
                                   -bound, bound),
        "bias": (jax.random.uniform(k_bih, (1, 4 * hidden), jnp.float32,
                                    -bound, bound)
                 + jax.random.uniform(k_bhh, (1, 4 * hidden), jnp.float32,
                                      -bound, bound)),
        "M": jax.random.normal(k_m, (hidden, hidden), jnp.float32) * xavier_std,
    }


if __name__ == "__main__":
    B, S, E, H, V = 2, 8, 32, 32, 50

    key = jax.random.PRNGKey(0)
    k_params, k_ctx, k_rsp = jax.random.split(key, 3)
    params = init_params(k_params, V, E, H)

    context_tokens = jax.random.randint(k_ctx, (B, S), 0, V, dtype=jnp.int32)
    response_tokens = jax.random.randint(k_rsp, (B, S), 0, V, dtype=jnp.int32)

    score = jax.jit(dual_encoder_forward)(params, context_tokens, response_tokens)
    score = jax.block_until_ready(score)

    assert score.shape == (B, 1) and score.dtype == jnp.float32
    assert bool(jnp.all(jnp.isfinite(score)))

    # Tolerance check against a pure-JAX f32 reference (kernel uses bf16 MXU
    # operands with f32 accumulation, so exact equality is not expected).
    ref = _reference_forward(params, context_tokens, response_tokens)
    assert bool(jnp.allclose(score, ref, rtol=5e-2, atol=5e-2)), (score, ref)

    print("KERNEL_OK")
</pallas_src>

<mosaic_0001>
module attributes {stable_mosaic.version = 11 : i64} {
  func.func @_dual_encoder_kernel(%arg0: i32, %arg1: memref<64x32xbf16, #tpu.memory_space<vmem>>, %arg2: memref<64x32xbf16, #tpu.memory_space<vmem>>, %arg3: memref<32x512xbf16, #tpu.memory_space<vmem>>, %arg4: memref<128x512xbf16, #tpu.memory_space<vmem>>, %arg5: memref<1x512xf32, #tpu.memory_space<vmem>>, %arg6: memref<128x128xbf16, #tpu.memory_space<vmem>>, %arg7: memref<8x128xf32, #tpu.memory_space<vmem>>, %arg8: memref<16x128xf32, #tpu.memory_space<vmem>>, %arg9: memref<16x128xf32, #tpu.memory_space<vmem>>, %arg10: memref<8x16x512xf32, #tpu.memory_space<vmem>>) attributes {dimension_semantics = [#tpu.dimension_semantics<arbitrary>], iteration_bounds = array<i64: 1>, scalar_prefetch = 0 : i64, scratch_operands = 3 : i64, tpu.core_type = #tpu.core_type<tc>, window_params = [{transform_indices = @transform_0, window_bounds = array<i64: 64, 32>}, {transform_indices = @transform_1, window_bounds = array<i64: 64, 32>}, {pipeline_mode = #tpu.pipeline_mode<synchronous>, transform_indices = @transform_2, window_bounds = array<i64: 32, 512>}, {pipeline_mode = #tpu.pipeline_mode<synchronous>, transform_indices = @transform_3, window_bounds = array<i64: 128, 512>}, {pipeline_mode = #tpu.pipeline_mode<synchronous>, transform_indices = @transform_4, window_bounds = array<i64: 1, 512>}, {pipeline_mode = #tpu.pipeline_mode<synchronous>, transform_indices = @transform_5, window_bounds = array<i64: 128, 128>}, {pipeline_mode = #tpu.pipeline_mode<synchronous>, transform_indices = @transform_6, window_bounds = array<i64: 8, 128>}]} {
    %c0_i32 = arith.constant 0 : i32
    %0 = arith.cmpi eq, %arg0, %c0_i32 : i32
    %1 = arith.extui %0 : i1 to i32
    %c0_i32_0 = arith.constant 0 : i32
    %2 = arith.cmpi ne, %1, %c0_i32_0 : i32
    scf.if %2 {
      %cst_73 = arith.constant 0.000000e+00 : f32
      %208 = vector.broadcast %cst_73 : f32 to vector<16x128xf32>
      %c0_74 = arith.constant 0 : index
      %c0_75 = arith.constant 0 : index
      %209 = vector.load %arg8[%c0_74, %c0_75] : memref<16x128xf32, #tpu.memory_space<vmem>>, vector<16x128xf32>
      tpu.vector_store %arg8[%c0_74, %c0_75], %208 {strides = array<i32>} : memref<16x128xf32, #tpu.memory_space<vmem>>, vector<16x128xf32>,
      %cst_76 = arith.constant 0.000000e+00 : f32
      %210 = vector.broadcast %cst_76 : f32 to vector<16x128xf32>
      %c0_77 = arith.constant 0 : index
      %c0_78 = arith.constant 0 : index
      %211 = vector.load %arg9[%c0_77, %c0_78] : memref<16x128xf32, #tpu.memory_space<vmem>>, vector<16x128xf32>
      tpu.vector_store %arg9[%c0_77, %c0_78], %210 {strides = array<i32>} : memref<16x128xf32, #tpu.memory_space<vmem>>, vector<16x128xf32>,
    } else {
    }
    %c0 = arith.constant 0 : index
    %c0_1 = arith.constant 0 : index
    %3 = vector.load %arg5[%c0, %c0_1] : memref<1x512xf32, #tpu.memory_space<vmem>>, vector<1x512xf32>
    %c0_2 = arith.constant 0 : index
    %c0_3 = arith.constant 0 : index
    %4 = vector.load %arg3[%c0_2, %c0_3] : memref<32x512xbf16, #tpu.memory_space<vmem>>, vector<32x512xbf16>
    %c0_4 = arith.constant 0 : index
    %c0_5 = arith.constant 0 : index
    %5 = vector.load %arg1[%c0_4, %c0_5] : memref<64x32xbf16, #tpu.memory_space<vmem>>, vector<64x32xbf16>
    %cst = arith.constant dense<0.000000e+00> : vector<64x512xf32>
    %6 = tpu.matmul %5, %4, %cst {dimension_numbers = #tpu.dot_dimension_numbers<[1], [0], [0], [1], [0, 0, 1, 1], [], []>} : vector<64x32xbf16>, vector<32x512xbf16>, vector<64x512xf32> -> vector<64x512xf32>
    %7 = vector.broadcast %3 : vector<1x512xf32> to vector<64x512xf32>
    %8 = arith.addf %6, %7 : vector<64x512xf32>
    %c0_6 = arith.constant 0 : index
    %c0_7 = arith.constant 0 : index
    %9 = vector.load %arg2[%c0_6, %c0_7] : memref<64x32xbf16, #tpu.memory_space<vmem>>, vector<64x32xbf16>
    %cst_8 = arith.constant dense<0.000000e+00> : vector<64x512xf32>
    %10 = tpu.matmul %9, %4, %cst_8 {dimension_numbers = #tpu.dot_dimension_numbers<[1], [0], [0], [1], [0, 0, 1, 1], [], []>} : vector<64x32xbf16>, vector<32x512xbf16>, vector<64x512xf32> -> vector<64x512xf32>
    %11 = vector.broadcast %3 : vector<1x512xf32> to vector<64x512xf32>
    %12 = arith.addf %10, %11 : vector<64x512xf32>
    %13 = vector.shape_cast %8 : vector<64x512xf32> to vector<8x8x512xf32>
    %c0_9 = arith.constant 0 : index
    %c0_10 = arith.constant 0 : index
    %c0_11 = arith.constant 0 : index
    %14 = vector.load %arg10[%c0_9, %c0_10, %c0_11] : memref<8x16x512xf32, #tpu.memory_space<vmem>>, vector<8x8x512xf32>
    tpu.vector_store %arg10[%c0_9, %c0_10, %c0_11], %13 {strides = array<i32>} : memref<8x16x512xf32, #tpu.memory_space<vmem>>, vector<8x8x512xf32>,
    %15 = vector.shape_cast %12 : vector<64x512xf32> to vector<8x8x512xf32>
    %c0_12 = arith.constant 0 : index
    %c8 = arith.constant 8 : index
    %c0_13 = arith.constant 0 : index
    %16 = vector.load %arg10[%c0_12, %c8, %c0_13] : memref<8x16x512xf32, #tpu.memory_space<vmem>>, vector<8x8x512xf32>
    tpu.vector_store %arg10[%c0_12, %c8, %c0_13], %15 {strides = array<i32>} : memref<8x16x512xf32, #tpu.memory_space<vmem>>, vector<8x8x512xf32>,
    %c0_14 = arith.constant 0 : index
    %c0_15 = arith.constant 0 : index
    %17 = vector.load %arg8[%c0_14, %c0_15] : memref<16x128xf32, #tpu.memory_space<vmem>>, vector<16x128xf32>
    %c0_16 = arith.constant 0 : index
    %c0_17 = arith.constant 0 : index
    %18 = vector.load %arg9[%c0_16, %c0_17] : memref<16x128xf32, #tpu.memory_space<vmem>>, vector<16x128xf32>
    %c0_i32_18 = arith.constant 0 : i32
    %19 = arith.index_cast %c0_i32_18 : i32 to index
    %c0_19 = arith.constant 0 : index
    %c0_20 = arith.constant 0 : index
    %20 = vector.load %arg10[%19, %c0_19, %c0_20] : memref<8x16x512xf32, #tpu.memory_space<vmem>>, vector<1x16x512xf32>
    %21 = vector.shape_cast %20 : vector<1x16x512xf32> to vector<16x512xf32>
    %22 = arith.truncf %17 : vector<16x128xf32> to vector<16x128xbf16>
    %c0_21 = arith.constant 0 : index
    %c0_22 = arith.constant 0 : index
    %23 = vector.load %arg4[%c0_21, %c0_22] : memref<128x512xbf16, #tpu.memory_space<vmem>>, vector<128x512xbf16>
    %cst_23 = arith.constant dense<0.000000e+00> : vector<16x512xf32>
    %24 = tpu.matmul %22, %23, %cst_23 {dimension_numbers = #tpu.dot_dimension_numbers<[1], [0], [0], [1], [0, 0, 1, 1], [], []>} : vector<16x128xbf16>, vector<128x512xbf16>, vector<16x512xf32> -> vector<16x512xf32>
    %25 = arith.addf %21, %24 : vector<16x512xf32>
    %26 = vector.extract_strided_slice %25 {offsets = [0, 0], sizes = [16, 384], strides = [1, 1]} : vector<16x512xf32> to vector<16x384xf32>
    %27 = arith.negf %26 : vector<16x384xf32>
    %28 = math.exp %27 : vector<16x384xf32>
    %cst_24 = arith.constant 1.000000e+00 : f32
    %29 = vector.broadcast %cst_24 : f32 to vector<16x384xf32>
    %30 = arith.addf %29, %28 : vector<16x384xf32>
    %31 = arith.divf %29, %30 : vector<16x384xf32>
    %32 = vector.extract_strided_slice %25 {offsets = [0, 384], sizes = [16, 128], strides = [1, 1]} : vector<16x512xf32> to vector<16x128xf32>
    %33 = math.tanh %32 : vector<16x128xf32>
    %34 = vector.extract_strided_slice %31 {offsets = [0, 128], sizes = [16, 128], strides = [1, 1]} : vector<16x384xf32> to vector<16x128xf32>
    %35 = arith.mulf %34, %18 : vector<16x128xf32>
    %36 = vector.extract_strided_slice %31 {offsets = [0, 0], sizes = [16, 128], strides = [1, 1]} : vector<16x384xf32> to vector<16x128xf32>
    %37 = arith.mulf %36, %33 : vector<16x128xf32>
    %38 = arith.addf %35, %37 : vector<16x128xf32>
    %39 = vector.extract_strided_slice %31 {offsets = [0, 256], sizes = [16, 128], strides = [1, 1]} : vector<16x384xf32> to vector<16x128xf32>
    %40 = math.tanh %38 : vector<16x128xf32>
    %41 = arith.mulf %39, %40 : vector<16x128xf32>
    %c1_i32 = arith.constant 1 : i32
    %42 = arith.index_cast %c1_i32 : i32 to index
    %c0_25 = arith.constant 0 : index
    %c0_26 = arith.constant 0 : index
    %43 = vector.load %arg10[%42, %c0_25, %c0_26] : memref<8x16x512xf32, #tpu.memory_space<vmem>>, vector<1x16x512xf32>
    %44 = vector.shape_cast %43 : vector<1x16x512xf32> to vector<16x512xf32>
    %45 = arith.truncf %41 : vector<16x128xf32> to vector<16x128xbf16>
    %c0_27 = arith.constant 0 : index
    %c0_28 = arith.constant 0 : index
    %46 = vector.load %arg4[%c0_27, %c0_28] : memref<128x512xbf16, #tpu.memory_space<vmem>>, vector<128x512xbf16>
    %cst_29 = arith.constant dense<0.000000e+00> : vector<16x512xf32>
    %47 = tpu.matmul %45, %46, %cst_29 {dimension_numbers = #tpu.dot_dimension_numbers<[1], [0], [0], [1], [0, 0, 1, 1], [], []>} : vector<16x128xbf16>, vector<128x512xbf16>, vector<16x512xf32> -> vector<16x512xf32>
    %48 = arith.addf %44, %47 : vector<16x512xf32>
    %49 = vector.extract_strided_slice %48 {offsets = [0, 0], sizes = [16, 384], strides = [1, 1]} : vector<16x512xf32> to vector<16x384xf32>
    %50 = arith.negf %49 : vector<16x384xf32>
    %51 = math.exp %50 : vector<16x384xf32>
    %cst_30 = arith.constant 1.000000e+00 : f32
    %52 = vector.broadcast %cst_30 : f32 to vector<16x384xf32>
    %53 = arith.addf %52, %51 : vector<16x384xf32>
    %54 = arith.divf %52, %53 : vector<16x384xf32>
    %55 = vector.extract_strided_slice %48 {offsets = [0, 384], sizes = [16, 128], strides = [1, 1]} : vector<16x512xf32> to vector<16x128xf32>
    %56 = math.tanh %55 : vector<16x128xf32>
    %57 = vector.extract_strided_slice %54 {offsets = [0, 128], sizes = [16, 128], strides = [1, 1]} : vector<16x384xf32> to vector<16x128xf32>
    %58 = arith.mulf %57, %38 : vector<16x128xf32>
    %59 = vector.extract_strided_slice %54 {offsets = [0, 0], sizes = [16, 128], strides = [1, 1]} : vector<16x384xf32> to vector<16x128xf32>
    %60 = arith.mulf %59, %56 : vector<16x128xf32>
    %61 = arith.addf %58, %60 : vector<16x128xf32>
    %62 = vector.extract_strided_slice %54 {offsets = [0, 256], sizes = [16, 128], strides = [1, 1]} : vector<16x384xf32> to vector<16x128xf32>
    %63 = math.tanh %61 : vector<16x128xf32>
    %64 = arith.mulf %62, %63 : vector<16x128xf32>
    %c2_i32 = arith.constant 2 : i32
    %65 = arith.index_cast %c2_i32 : i32 to index
    %c0_31 = arith.constant 0 : index
    %c0_32 = arith.constant 0 : index
    %66 = vector.load %arg10[%65, %c0_31, %c0_32] : memref<8x16x512xf32, #tpu.memory_space<vmem>>, vector<1x16x512xf32>
    %67 = vector.shape_cast %66 : vector<1x16x512xf32> to vector<16x512xf32>
    %68 = arith.truncf %64 : vector<16x128xf32> to vector<16x128xbf16>
    %c0_33 = arith.constant 0 : index
    %c0_34 = arith.constant 0 : index
    %69 = vector.load %arg4[%c0_33, %c0_34] : memref<128x512xbf16, #tpu.memory_space<vmem>>, vector<128x512xbf16>
    %cst_35 = arith.constant dense<0.000000e+00> : vector<16x512xf32>
    %70 = tpu.matmul %68, %69, %cst_35 {dimension_numbers = #tpu.dot_dimension_numbers<[1], [0], [0], [1], [0, 0, 1, 1], [], []>} : vector<16x128xbf16>, vector<128x512xbf16>, vector<16x512xf32> -> vector<16x512xf32>
    %71 = arith.addf %67, %70 : vector<16x512xf32>
    %72 = vector.extract_strided_slice %71 {offsets = [0, 0], sizes = [16, 384], strides = [1, 1]} : vector<16x512xf32> to vector<16x384xf32>
    %73 = arith.negf %72 : vector<16x384xf32>
    %74 = math.exp %73 : vector<16x384xf32>
    %cst_36 = arith.constant 1.000000e+00 : f32
    %75 = vector.broadcast %cst_36 : f32 to vector<16x384xf32>
    %76 = arith.addf %75, %74 : vector<16x384xf32>
    %77 = arith.divf %75, %76 : vector<16x384xf32>
    %78 = vector.extract_strided_slice %71 {offsets = [0, 384], sizes = [16, 128], strides = [1, 1]} : vector<16x512xf32> to vector<16x128xf32>
    %79 = math.tanh %78 : vector<16x128xf32>
    %80 = vector.extract_strided_slice %77 {offsets = [0, 128], sizes = [16, 128], strides = [1, 1]} : vector<16x384xf32> to vector<16x128xf32>
    %81 = arith.mulf %80, %61 : vector<16x128xf32>
    %82 = vector.extract_strided_slice %77 {offsets = [0, 0], sizes = [16, 128], strides = [1, 1]} : vector<16x384xf32> to vector<16x128xf32>
    %83 = arith.mulf %82, %79 : vector<16x128xf32>
    %84 = arith.addf %81, %83 : vector<16x128xf32>
    %85 = vector.extract_strided_slice %77 {offsets = [0, 256], sizes = [16, 128], strides = [1, 1]} : vector<16x384xf32> to vector<16x128xf32>
    %86 = math.tanh %84 : vector<16x128xf32>
    %87 = arith.mulf %85, %86 : vector<16x128xf32>
    %c3_i32 = arith.constant 3 : i32
    %88 = arith.index_cast %c3_i32 : i32 to index
    %c0_37 = arith.constant 0 : index
    %c0_38 = arith.constant 0 : index
    %89 = vector.load %arg10[%88, %c0_37, %c0_38] : memref<8x16x512xf32, #tpu.memory_space<vmem>>, vector<1x16x512xf32>
    %90 = vector.shape_cast %89 : vector<1x16x512xf32> to vector<16x512xf32>
    %91 = arith.truncf %87 : vector<16x128xf32> to vector<16x128xbf16>
    %c0_39 = arith.constant 0 : index
    %c0_40 = arith.constant 0 : index
    %92 = vector.load %arg4[%c0_39, %c0_40] : memref<128x512xbf16, #tpu.memory_space<vmem>>, vector<128x512xbf16>
    %cst_41 = arith.constant dense<0.000000e+00> : vector<16x512xf32>
    %93 = tpu.matmul %91, %92, %cst_41 {dimension_numbers = #tpu.dot_dimension_numbers<[1], [0], [0], [1], [0, 0, 1, 1], [], []>} : vector<16x128xbf16>, vector<128x512xbf16>, vector<16x512xf32> -> vector<16x512xf32>
    %94 = arith.addf %90, %93 : vector<16x512xf32>
    %95 = vector.extract_strided_slice %94 {offsets = [0, 0], sizes = [16, 384], strides = [1, 1]} : vector<16x512xf32> to vector<16x384xf32>
    %96 = arith.negf %95 : vector<16x384xf32>
    %97 = math.exp %96 : vector<16x384xf32>
    %cst_42 = arith.constant 1.000000e+00 : f32
    %98 = vector.broadcast %cst_42 : f32 to vector<16x384xf32>
    %99 = arith.addf %98, %97 : vector<16x384xf32>
    %100 = arith.divf %98, %99 : vector<16x384xf32>
    %101 = vector.extract_strided_slice %94 {offsets = [0, 384], sizes = [16, 128], strides = [1, 1]} : vector<16x512xf32> to vector<16x128xf32>
    %102 = math.tanh %101 : vector<16x128xf32>
    %103 = vector.extract_strided_slice %100 {offsets = [0, 128], sizes = [16, 128], strides = [1, 1]} : vector<16x384xf32> to vector<16x128xf32>
    %104 = arith.mulf %103, %84 : vector<16x128xf32>
    %105 = vector.extract_strided_slice %100 {offsets = [0, 0], sizes = [16, 128], strides = [1, 1]} : vector<16x384xf32> to vector<16x128xf32>
    %106 = arith.mulf %105, %102 : vector<16x128xf32>
    %107 = arith.addf %104, %106 : vector<16x128xf32>
    %108 = vector.extract_strided_slice %100 {offsets = [0, 256], sizes = [16, 128], strides = [1, 1]} : vector<16x384xf32> to vector<16x128xf32>
    %109 = math.tanh %107 : vector<16x128xf32>
    %110 = arith.mulf %108, %109 : vector<16x128xf32>
    %c4_i32 = arith.constant 4 : i32
    %111 = arith.index_cast %c4_i32 : i32 to index
    %c0_43 = arith.constant 0 : index
    %c0_44 = arith.constant 0 : index
    %112 = vector.load %arg10[%111, %c0_43, %c0_44] : memref<8x16x512xf32, #tpu.memory_space<vmem>>, vector<1x16x512xf32>
    %113 = vector.shape_cast %112 : vector<1x16x512xf32> to vector<16x512xf32>
    %114 = arith.truncf %110 : vector<16x128xf32> to vector<16x128xbf16>
    %c0_45 = arith.constant 0 : index
    %c0_46 = arith.constant 0 : index
    %115 = vector.load %arg4[%c0_45, %c0_46] : memref<128x512xbf16, #tpu.memory_space<vmem>>, vector<128x512xbf16>
    %cst_47 = arith.constant dense<0.000000e+00> : vector<16x512xf32>
    %116 = tpu.matmul %114, %115, %cst_47 {dimension_numbers = #tpu.dot_dimension_numbers<[1], [0], [0], [1], [0, 0, 1, 1], [], []>} : vector<16x128xbf16>, vector<128x512xbf16>, vector<16x512xf32> -> vector<16x512xf32>
    %117 = arith.addf %113, %116 : vector<16x512xf32>
    %118 = vector.extract_strided_slice %117 {offsets = [0, 0], sizes = [16, 384], strides = [1, 1]} : vector<16x512xf32> to vector<16x384xf32>
    %119 = arith.negf %118 : vector<16x384xf32>
    %120 = math.exp %119 : vector<16x384xf32>
    %cst_48 = arith.constant 1.000000e+00 : f32
    %121 = vector.broadcast %cst_48 : f32 to vector<16x384xf32>
    %122 = arith.addf %121, %120 : vector<16x384xf32>
    %123 = arith.divf %121, %122 : vector<16x384xf32>
    %124 = vector.extract_strided_slice %117 {offsets = [0, 384], sizes = [16, 128], strides = [1, 1]} : vector<16x512xf32> to vector<16x128xf32>
    %125 = math.tanh %124 : vector<16x128xf32>
    %126 = vector.extract_strided_slice %123 {offsets = [0, 128], sizes = [16, 128], strides = [1, 1]} : vector<16x384xf32> to vector<16x128xf32>
    %127 = arith.mulf %126, %107 : vector<16x128xf32>
    %128 = vector.extract_strided_slice %123 {offsets = [0, 0], sizes = [16, 128], strides = [1, 1]} : vector<16x384xf32> to vector<16x128xf32>
    %129 = arith.mulf %128, %125 : vector<16x128xf32>
    %130 = arith.addf %127, %129 : vector<16x128xf32>
    %131 = vector.extract_strided_slice %123 {offsets = [0, 256], sizes = [16, 128], strides = [1, 1]} : vector<16x384xf32> to vector<16x128xf32>
    %132 = math.tanh %130 : vector<16x128xf32>
    %133 = arith.mulf %131, %132 : vector<16x128xf32>
    %c5_i32 = arith.constant 5 : i32
    %134 = arith.index_cast %c5_i32 : i32 to index
    %c0_49 = arith.constant 0 : index
    %c0_50 = arith.constant 0 : index
    %135 = vector.load %arg10[%134, %c0_49, %c0_50] : memref<8x16x512xf32, #tpu.memory_space<vmem>>, vector<1x16x512xf32>
    %136 = vector.shape_cast %135 : vector<1x16x512xf32> to vector<16x512xf32>
    %137 = arith.truncf %133 : vector<16x128xf32> to vector<16x128xbf16>
    %c0_51 = arith.constant 0 : index
    %c0_52 = arith.constant 0 : index
    %138 = vector.load %arg4[%c0_51, %c0_52] : memref<128x512xbf16, #tpu.memory_space<vmem>>, vector<128x512xbf16>
    %cst_53 = arith.constant dense<0.000000e+00> : vector<16x512xf32>
    %139 = tpu.matmul %137, %138, %cst_53 {dimension_numbers = #tpu.dot_dimension_numbers<[1], [0], [0], [1], [0, 0, 1, 1], [], []>} : vector<16x128xbf16>, vector<128x512xbf16>, vector<16x512xf32> -> vector<16x512xf32>
    %140 = arith.addf %136, %139 : vector<16x512xf32>
    %141 = vector.extract_strided_slice %140 {offsets = [0, 0], sizes = [16, 384], strides = [1, 1]} : vector<16x512xf32> to vector<16x384xf32>
    %142 = arith.negf %141 : vector<16x384xf32>
    %143 = math.exp %142 : vector<16x384xf32>
    %cst_54 = arith.constant 1.000000e+00 : f32
    %144 = vector.broadcast %cst_54 : f32 to vector<16x384xf32>
    %145 = arith.addf %144, %143 : vector<16x384xf32>
    %146 = arith.divf %144, %145 : vector<16x384xf32>
    %147 = vector.extract_strided_slice %140 {offsets = [0, 384], sizes = [16, 128], strides = [1, 1]} : vector<16x512xf32> to vector<16x128xf32>
    %148 = math.tanh %147 : vector<16x128xf32>
    %149 = vector.extract_strided_slice %146 {offsets = [0, 128], sizes = [16, 128], strides = [1, 1]} : vector<16x384xf32> to vector<16x128xf32>
    %150 = arith.mulf %149, %130 : vector<16x128xf32>
    %151 = vector.extract_strided_slice %146 {offsets = [0, 0], sizes = [16, 128], strides = [1, 1]} : vector<16x384xf32> to vector<16x128xf32>
    %152 = arith.mulf %151, %148 : vector<16x128xf32>
    %153 = arith.addf %150, %152 : vector<16x128xf32>
    %154 = vector.extract_strided_slice %146 {offsets = [0, 256], sizes = [16, 128], strides = [1, 1]} : vector<16x384xf32> to vector<16x128xf32>
    %155 = math.tanh %153 : vector<16x128xf32>
    %156 = arith.mulf %154, %155 : vector<16x128xf32>
    %c6_i32 = arith.constant 6 : i32
    %157 = arith.index_cast %c6_i32 : i32 to index
    %c0_55 = arith.constant 0 : index
    %c0_56 = arith.constant 0 : index
    %158 = vector.load %arg10[%157, %c0_55, %c0_56] : memref<8x16x512xf32, #tpu.memory_space<vmem>>, vector<1x16x512xf32>
    %159 = vector.shape_cast %158 : vector<1x16x512xf32> to vector<16x512xf32>
    %160 = arith.truncf %156 : vector<16x128xf32> to vector<16x128xbf16>
    %c0_57 = arith.constant 0 : index
    %c0_58 = arith.constant 0 : index
    %161 = vector.load %arg4[%c0_57, %c0_58] : memref<128x512xbf16, #tpu.memory_space<vmem>>, vector<128x512xbf16>
    %cst_59 = arith.constant dense<0.000000e+00> : vector<16x512xf32>
    %162 = tpu.matmul %160, %161, %cst_59 {dimension_numbers = #tpu.dot_dimension_numbers<[1], [0], [0], [1], [0, 0, 1, 1], [], []>} : vector<16x128xbf16>, vector<128x512xbf16>, vector<16x512xf32> -> vector<16x512xf32>
    %163 = arith.addf %159, %162 : vector<16x512xf32>
    %164 = vector.extract_strided_slice %163 {offsets = [0, 0], sizes = [16, 384], strides = [1, 1]} : vector<16x512xf32> to vector<16x384xf32>
    %165 = arith.negf %164 : vector<16x384xf32>
    %166 = math.exp %165 : vector<16x384xf32>
    %cst_60 = arith.constant 1.000000e+00 : f32
    %167 = vector.broadcast %cst_60 : f32 to vector<16x384xf32>
    %168 = arith.addf %167, %166 : vector<16x384xf32>
    %169 = arith.divf %167, %168 : vector<16x384xf32>
    %170 = vector.extract_strided_slice %163 {offsets = [0, 384], sizes = [16, 128], strides = [1, 1]} : vector<16x512xf32> to vector<16x128xf32>
    %171 = math.tanh %170 : vector<16x128xf32>
    %172 = vector.extract_strided_slice %169 {offsets = [0, 128], sizes = [16, 128], strides = [1, 1]} : vector<16x384xf32> to vector<16x128xf32>
    %173 = arith.mulf %172, %153 : vector<16x128xf32>
    %174 = vector.extract_strided_slice %169 {offsets = [0, 0], sizes = [16, 128], strides = [1, 1]} : vector<16x384xf32> to vector<16x128xf32>
    %175 = arith.mulf %174, %171 : vector<16x128xf32>
    %176 = arith.addf %173, %175 : vector<16x128xf32>
    %177 = vector.extract_strided_slice %169 {offsets = [0, 256], sizes = [16, 128], strides = [1, 1]} : vector<16x384xf32> to vector<16x128xf32>
    %178 = math.tanh %176 : vector<16x128xf32>
    %179 = arith.mulf %177, %178 : vector<16x128xf32>
    %c7_i32 = arith.constant 7 : i32
    %180 = arith.index_cast %c7_i32 : i32 to index
    %c0_61 = arith.constant 0 : index
    %c0_62 = arith.constant 0 : index
    %181 = vector.load %arg10[%180, %c0_61, %c0_62] : memref<8x16x512xf32, #tpu.memory_space<vmem>>, vector<1x16x512xf32>
    %182 = vector.shape_cast %181 : vector<1x16x512xf32> to vector<16x512xf32>
    %183 = arith.truncf %179 : vector<16x128xf32> to vector<16x128xbf16>
    %c0_63 = arith.constant 0 : index
    %c0_64 = arith.constant 0 : index
    %184 = vector.load %arg4[%c0_63, %c0_64] : memref<128x512xbf16, #tpu.memory_space<vmem>>, vector<128x512xbf16>
    %cst_65 = arith.constant dense<0.000000e+00> : vector<16x512xf32>
    %185 = tpu.matmul %183, %184, %cst_65 {dimension_numbers = #tpu.dot_dimension_numbers<[1], [0], [0], [1], [0, 0, 1, 1], [], []>} : vector<16x128xbf16>, vector<128x512xbf16>, vector<16x512xf32> -> vector<16x512xf32>
    %186 = arith.addf %182, %185 : vector<16x512xf32>
    %187 = vector.extract_strided_slice %186 {offsets = [0, 0], sizes = [16, 384], strides = [1, 1]} : vector<16x512xf32> to vector<16x384xf32>
    %188 = arith.negf %187 : vector<16x384xf32>
    %189 = math.exp %188 : vector<16x384xf32>
    %cst_66 = arith.constant 1.000000e+00 : f32
    %190 = vector.broadcast %cst_66 : f32 to vector<16x384xf32>
    %191 = arith.addf %190, %189 : vector<16x384xf32>
    %192 = arith.divf %190, %191 : vector<16x384xf32>
    %193 = vector.extract_strided_slice %186 {offsets = [0, 384], sizes = [16, 128], strides = [1, 1]} : vector<16x512xf32> to vector<16x128xf32>
    %194 = math.tanh %193 : vector<16x128xf32>
    %195 = vector.extract_strided_slice %192 {offsets = [0, 128], sizes = [16, 128], strides = [1, 1]} : vector<16x384xf32> to vector<16x128xf32>
    %196 = arith.mulf %195, %176 : vector<16x128xf32>
    %197 = vector.extract_strided_slice %192 {offsets = [0, 0], sizes = [16, 128], strides = [1, 1]} : vector<16x384xf32> to vector<16x128xf32>
    %198 = arith.mulf %197, %194 : vector<16x128xf32>
    %199 = arith.addf %196, %198 : vector<16x128xf32>
    %200 = vector.extract_strided_slice %192 {offsets = [0, 256], sizes = [16, 128], strides = [1, 1]} : vector<16x384xf32> to vector<16x128xf32>
    %201 = math.tanh %199 : vector<16x128xf32>
    %202 = arith.mulf %200, %201 : vector<16x128xf32>
    %c8_i32 = arith.constant 8 : i32
    %c0_67 = arith.constant 0 : index
    %c0_68 = arith.constant 0 : index
    %203 = vector.load %arg8[%c0_67, %c0_68] : memref<16x128xf32, #tpu.memory_space<vmem>>, vector<16x128xf32>
    tpu.vector_store %arg8[%c0_67, %c0_68], %202 {strides = array<i32>} : memref<16x128xf32, #tpu.memory_space<vmem>>, vector<16x128xf32>,
    %c0_69 = arith.constant 0 : index
    %c0_70 = arith.constant 0 : index
    %204 = vector.load %arg9[%c0_69, %c0_70] : memref<16x128xf32, #tpu.memory_space<vmem>>, vector<16x128xf32>
    tpu.vector_store %arg9[%c0_69, %c0_70], %199 {strides = array<i32>} : memref<16x128xf32, #tpu.memory_space<vmem>>, vector<16x128xf32>,
    %c0_i32_71 = arith.constant 0 : i32
    %205 = arith.cmpi eq, %arg0, %c0_i32_71 : i32
    %206 = arith.extui %205 : i1 to i32
    %c0_i32_72 = arith.constant 0 : i32
    %207 = arith.cmpi ne, %206, %c0_i32_72 : i32
    scf.if %207 {
      %208 = vector.extract_strided_slice %202 {offsets = [0, 0], sizes = [8, 128], strides = [1, 1]} : vector<16x128xf32> to vector<8x128xf32>
      %209 = vector.extract_strided_slice %202 {offsets = [8, 0], sizes = [8, 128], strides = [1, 1]} : vector<16x128xf32> to vector<8x128xf32>
      %210 = arith.truncf %208 : vector<8x128xf32> to vector<8x128xbf16>
      %c0_73 = arith.constant 0 : index
      %c0_74 = arith.constant 0 : index
      %211 = vector.load %arg6[%c0_73, %c0_74] : memref<128x128xbf16, #tpu.memory_space<vmem>>, vector<128x128xbf16>
      %cst_75 = arith.constant dense<0.000000e+00> : vector<8x128xf32>
      %212 = tpu.matmul %210, %211, %cst_75 {dimension_numbers = #tpu.dot_dimension_numbers<[1], [0], [0], [1], [0, 0, 1, 1], [], []>} : vector<8x128xbf16>, vector<128x128xbf16>, vector<8x128xf32> -> vector<8x128xf32>
      %213 = arith.mulf %212, %209 : vector<8x128xf32>
      %c0_76 = arith.constant 0 : index
      %c0_77 = arith.constant 0 : index
      %214 = vector.load %arg7[%c0_76, %c0_77] : memref<8x128xf32, #tpu.memory_space<vmem>>, vector<8x128xf32>
      tpu.vector_store %arg7[%c0_76, %c0_77], %213 {strides = array<i32>} : memref<8x128xf32, #tpu.memory_space<vmem>>, vector<8x128xf32>,
    } else {
    }
    return
  }
  func.func @transform_0(%arg0: i32) -> (i32, i32) {
    %c0_i32 = arith.constant 0 : i32
    %c0_i32_0 = arith.constant 0 : i32
    return %arg0, %c0_i32 : i32, i32
  }
  func.func @transform_1(%arg0: i32) -> (i32, i32) {
    %c0_i32 = arith.constant 0 : i32
    %c0_i32_0 = arith.constant 0 : i32
    return %arg0, %c0_i32 : i32, i32
  }
  func.func @transform_2(%arg0: i32) -> (i32, i32) {
    %c0_i32 = arith.constant 0 : i32
    %c0_i32_0 = arith.constant 0 : i32
    %c0_i32_1 = arith.constant 0 : i32
    return %c0_i32, %c0_i32_0 : i32, i32
  }
  func.func @transform_3(%arg0: i32) -> (i32, i32) {
    %c0_i32 = arith.constant 0 : i32
    %c0_i32_0 = arith.constant 0 : i32
    %c0_i32_1 = arith.constant 0 : i32
    return %c0_i32, %c0_i32_0 : i32, i32
  }
  func.func @transform_4(%arg0: i32) -> (i32, i32) {
    %c0_i32 = arith.constant 0 : i32
    %c0_i32_0 = arith.constant 0 : i32
    %c0_i32_1 = arith.constant 0 : i32
    return %c0_i32, %c0_i32_0 : i32, i32
  }
  func.func @transform_5(%arg0: i32) -> (i32, i32) {
    %c0_i32 = arith.constant 0 : i32
    %c0_i32_0 = arith.constant 0 : i32
    %c0_i32_1 = arith.constant 0 : i32
    return %c0_i32, %c0_i32_0 : i32, i32
  }
  func.func @transform_6(%arg0: i32) -> (i32, i32) {
    %c0_i32 = arith.constant 0 : i32
    %c0_i32_0 = arith.constant 0 : i32
    %c0_i32_1 = arith.constant 0 : i32
    return %c0_i32, %c0_i32_0 : i32, i32
  }
}

</mosaic_0001>

<bundles_post_ra>
// kernel: dual_encoder_forward.1
= control target key start
LH: loop header
LB: loop body
LE: loop exit
PB: predicated region body
PF: predicated region fallthrough
CT: control target
= control target key end

     0   :  { %v3655_v1 = vmov 0   ;;  %vm130_vm0 = vcmask 261120   ;;  %v2590_v36 = vmov 0.0|0.0   ;;  %v50_v50 = vlaneseq  ;;  %s3648_s2 = inlined_call_operand.vmem [shape: bf16[32,512], index: 2, kind: input, shape index: {}]   ;;  %s3649_s0 = inlined_call_operand.vmem [shape: bf16[64,32], index: 0, kind: input, shape index: {}]   ;;  %s3650_s1 = inlined_call_operand.vmem [shape: bf16[64,32], index: 1, kind: input, shape index: {}]   ;;  %s3651_s3 = inlined_call_operand.vmem [shape: bf16[128,512], index: 3, kind: input, shape index: {}]   ;;  %s3652_s4 = inlined_call_operand.vmem [shape: f32[1,512], index: 4, kind: input, shape index: {}]   ;;  %s3653_s5 = inlined_call_operand.vmem [shape: bf16[128,128], index: 5, kind: input, shape index: {}]   ;;  %s3654_s6 = inlined_call_operand.vmem [shape: f32[8,128], index: 6, kind: output, shape index: {}]  }
   0x1   :  { %v2225_v0 = vld [vmem:[%s3648_s2 + $0x4] ss:$16 sps:$4 sm:$0xff]   ;;  %175 = vmatprep.mubr.bf16.mxu0 %v3655_v1  ;;  %195 = vmatprep.mubr.bf16.mxu1 %v3655_v1  ;;  %v2227_v2 = vld [vmem:[%s3648_s2] ss:$16 sps:$4 sm:$0xff]   ;;  %v2235_v6 = vld [vmem:[%s3648_s2 + $0xc] ss:$16 sps:$4 sm:$0xff]  }
   0x2   :  { %143 = vmatprep.subr.bf16.mxu0 %v2225_v0  ;;  %2217 = vmatprep.subr.bf16.mxu1 %v2225_v0  ;;  %v2228_v3 = vld [vmem:[%s3648_s2 + $0x24] ss:$16 sps:$4 sm:$0xff]   ;;  %v2230_v4 = vld [vmem:[%s3648_s2 + $0x20] ss:$16 sps:$4 sm:$0xff]   ;;  %v2233_v8 = vld [vmem:[%s3648_s2 + $0x8] ss:$16 sps:$4 sm:$0xff]  }
   0x3   :  { %144 = vmatpush1.bf16.msra.mxu0 %v2227_v2  ;;  %2219 = vmatpush1.bf16.msra.mxu1 %v2227_v2  ;;  %v2231_v5 = vld [vmem:[%s3649_s0] sm:$0xff]   ;;  %v2651_v7 = vld [vmem:[%s3649_s0 + $0x10] sm:$0xff]   ;;  %v2240_v9 = vld [vmem:[%s3648_s2 + $0x2c] ss:$16 sps:$4 sm:$0xff]   ;;  %v51_v51 = vshrl.u32 %v50_v50, 7  ;;  %vm2592_vm1 = vmmov 0  }
   0x4   :  { %145 = vmatprep.subr.bf16.mxu0 %v2228_v3  ;;  %2218 = vmatprep.subr.bf16.mxu1 %v2228_v3  ;;  %v2238_v10 = vld [vmem:[%s3648_s2 + $0x28] ss:$16 sps:$4 sm:$0xff]   ;;  %v2676_v13 = vld [vmem:[%s3651_s3 + $0x4] ss:$16 sps:$4 sm:$0xff]   ;;  %v2689_v15 = vld [vmem:[%s3651_s3] ss:$16 sps:$4 sm:$0xff]  }
   0x5   :  { %v2236_v11 = vld [vmem:[%s3649_s0 + $0x8] sm:$0xff]   ;;  %v2237_v12 = vld [vmem:[%s3649_s0 + $0x18] sm:$0xff]   ;;  %v2241_v14 = vld [vmem:[%s3650_s1] sm:$0xff]   ;;  %v52_v52 = vsub.s32 0, %v51_v51  ;;  %v56_v54 = vsub.s32 1, %v51_v51 }
   0x6   :  { %v2694_v16 = vld [vmem:[%s3651_s3 + $0x24] ss:$16 sps:$4 sm:$0xff]   ;;  %v2702_v17 = vld [vmem:[%s3651_s3 + $0x20] ss:$16 sps:$4 sm:$0xff]   ;;  %v2714_v19 = vld [vmem:[%s3651_s3 + $0xc] ss:$16 sps:$4 sm:$0xff]  }
   0x7   :  { %146 = vmatpush1.bf16.msra.mxu0 %v2230_v4  ;;  %2220 = vmatpush1.bf16.msra.mxu1 %v2230_v4  ;;  %v2707_v18 = vld [vmem:[%s3651_s3 + $0x44] ss:$16 sps:$4 sm:$0xff]   ;;  %v2248_v20 = vld [vmem:[%s3650_s1 + $0x8] sm:$0xff]   ;;  %v2724_v21 = vld [vmem:[%s3651_s3 + $0x40] ss:$16 sps:$4 sm:$0xff]  }
   0x8   :  { %216 = vmatprep.subr.bf16.mxu1 %v2235_v6  ;;  %329 = vmatprep.subr.bf16.mxu0 %v2225_v0  ;;  %v2730_v22 = vld [vmem:[%s3651_s3 + $0x64] ss:$16 sps:$4 sm:$0xff]   ;;  %v2739_v23 = vld [vmem:[%s3651_s3 + $0x60] ss:$16 sps:$4 sm:$0xff]   ;;  %v2262_v30 = vld [vmem:[%s3650_s1 + $0x18] sm:$0xff]  }
   0x9   :  { %v2747_v24 = vld [vmem:[%s3651_s3 + $0x84] ss:$16 sps:$4 sm:$0xff]   ;;  %v2756_v26 = vld [vmem:[%s3651_s3 + $0x80] ss:$16 sps:$4 sm:$0xff]   ;;  %v2811_v34 = vld [vmem:[%s3651_s3 + $0x8] ss:$16 sps:$4 sm:$0xff]  }
   0xa   :  { %2080 = vmatmul.mubr.msk.bf16.vlgmr.msra.gmra.mrb[0].mxu0 %vm130_vm0, %v2231_v5  ;;  %2082 = vmatmul.mubr.msk.bf16.vlgmr.msra.gmra.mrb[0].mxu1 %vm130_vm0, %v2651_v7  ;;  %v2255_v25 = vld [vmem:[%s3650_s1 + $0x10] sm:$0xff]   ;;  %v2816_v35 = vld [vmem:[%s3651_s3 + $0x2c] ss:$16 sps:$4 sm:$0xff]   ;;  %v2824_v37 = vld [vmem:[%s3651_s3 + $0x28] ss:$16 sps:$4 sm:$0xff]  }
   0xb   :  { %217 = vmatpush1.bf16.msra.mxu1 %v2233_v8  ;;  %185 = vmatprep.mubr.bf16.mxu0 %v3655_v1  ;;  %v2762_v27 = vld [vmem:[%s3651_s3 + $0xa4] ss:$16 sps:$4 sm:$0xff]   ;;  %v2771_v28 = vld [vmem:[%s3651_s3 + $0xa0] ss:$16 sps:$4 sm:$0xff]   ;;  %v2831_v38 = vld [vmem:[%s3651_s3 + $0x4c] ss:$16 sps:$4 sm:$0xff]  }
   0xc   :  { %205 = vmatprep.mubr.bf16.mxu1 %v3655_v1  ;;  %218 = vmatprep.subr.bf16.mxu1 %v2240_v9  ;;  %v2779_v29 = vld [vmem:[%s3651_s3 + $0xc4] ss:$16 sps:$4 sm:$0xff]   ;;  %v2788_v31 = vld [vmem:[%s3651_s3 + $0xc0] ss:$16 sps:$4 sm:$0xff]   ;;  %v2840_v39 = vld [vmem:[%s3651_s3 + $0x48] ss:$16 sps:$4 sm:$0xff]  }
   0xd   :  { %330 = vmatpush1.bf16.msra.mxu0 %v2227_v2  ;;  %v2794_v32 = vld [vmem:[%s3651_s3 + $0xe4] ss:$16 sps:$4 sm:$0xff]   ;;  %v2802_v33 = vld [vmem:[%s3651_s3 + $0xe0] ss:$16 sps:$4 sm:$0xff]   ;;  %v2846_v40 = vld [vmem:[%s3651_s3 + $0x6c] ss:$16 sps:$4 sm:$0xff]  }
   0xe   :  { %331 = vmatprep.subr.bf16.mxu0 %v2228_v3  ;;  %v2855_v41 = vld [vmem:[%s3651_s3 + $0x68] ss:$16 sps:$4 sm:$0xff]   ;;  %v2862_v42 = vld [vmem:[%s3651_s3 + $0x8c] ss:$16 sps:$4 sm:$0xff]   ;;  %v32_v53 = vld [vmem:[%s3652_s4] sm:$0xf] }
   0xf   :  { %219 = vmatpush1.bf16.msra.mxu1 %v2238_v10  ;;  %v2870_v43 = vld [vmem:[%s3651_s3 + $0x88] ss:$16 sps:$4 sm:$0xff]   ;;  %v2876_v44 = vld [vmem:[%s3651_s3 + $0xac] ss:$16 sps:$4 sm:$0xff]   ;;  %v2945_v55 = vrot.slane %v32_v53, %v52_v52  ;;  %v2947_v56 = vrot.slane %v32_v53, %v56_v54 }
  0x10   :  { %402 = vmatprep.subr.bf16.mxu1 %v2235_v6  ;;  %v2885_v45 = vld [vmem:[%s3651_s3 + $0xa8] ss:$16 sps:$4 sm:$0xff]   ;;  %v2892_v46 = vld [vmem:[%s3651_s3 + $0xcc] ss:$16 sps:$4 sm:$0xff]  }
  0x11   :  { %332 = vmatpush1.bf16.msra.mxu0 %v2230_v4  ;;  %v2900_v47 = vld [vmem:[%s3651_s3 + $0xc8] ss:$16 sps:$4 sm:$0xff]   ;;  %v2906_v48 = vld [vmem:[%s3651_s3 + $0xec] ss:$16 sps:$4 sm:$0xff]  }
  0x12   :  { %2081 = vmatmul.mubr.msk.bf16.gmra.mrb[4].mxu0 %vm130_vm0, %v2236_v11  ;;  %2083 = vmatmul.mubr.msk.bf16.gmra.mrb[4].mxu1 %vm130_vm0, %v2237_v12  ;;  %v2915_v49 = vld [vmem:[%s3651_s3 + $0xe8] ss:$16 sps:$4 sm:$0xff]  }
  0x13   :  { %248 = vmatprep.mubr.bf16.mxu1 %v3655_v1  ;;  %361 = vmatprep.mubr.bf16.mxu0 %v3655_v1 }
  0x14   :  { %744 = vmatprep.subr.bf16.mxu0 %v2676_v13 }
  0x1a   :  { %2084 = vmatmul.mubr.msk.bf16.vlgmr.msra.gmra.mrb[8].mxu1 %vm130_vm0, %v2231_v5  ;;  %2092 = vmatmul.mubr.msk.bf16.vlgmr.msra.gmra.mrb[8].mxu0 %vm130_vm0, %v2241_v14 }
  0x1b   :  { %403 = vmatpush1.bf16.msra.mxu1 %v2233_v8  ;;  %745 = vmatpush1.bf16.msra.mxu0 %v2689_v15 }
  0x1c   :  { %746 = vmatprep.subr.bf16.mxu0 %v2694_v16  ;;  %258 = vmatprep.mubr.bf16.mxu1 %v3655_v1 }
  0x1d   :  { %371 = vmatprep.mubr.bf16.mxu0 %v3655_v1  ;;  %404 = vmatprep.subr.bf16.mxu1 %v2240_v9 }
  0x1f   :  { %747 = vmatpush1.bf16.msra.mxu0 %v2702_v17  ;;  %405 = vmatpush1.bf16.msra.mxu1 %v2238_v10 }
  0x20   :  { %748 = vmatprep.subr.bf16.mxu0 %v2707_v18  ;;  %787 = vmatprep.subr.bf16.mxu1 %v2714_v19 }
  0x22   :  { %2085 = vmatmul.mubr.msk.bf16.gmra.mrb[12].mxu1 %vm130_vm0, %v2236_v11  ;;  %2093 = vmatmul.mubr.msk.bf16.gmra.mrb[12].mxu0 %vm130_vm0, %v2248_v20 }
  0x23   :  { %749 = vmatpush1.bf16.msra.mxu0 %v2724_v21  ;;  %268 = vmatprep.mubr.bf16.mxu1 %v3655_v1 }
  0x24   :  { %750 = vmatprep.subr.bf16.mxu0 %v2730_v22  ;;  %381 = vmatprep.mubr.bf16.mxu0 %v3655_v1 }
  0x27   :  { %751 = vmatpush1.bf16.msra.mxu0 %v2739_v23 }
  0x28   :  { %752 = vmatprep.subr.bf16.mxu0 %v2747_v24 }
  0x2a   :  { %2086 = vmatmul.mubr.msk.bf16.gmra.mrb[16].mxu1 %vm130_vm0, %v2651_v7  ;;  %2094 = vmatmul.mubr.msk.bf16.gmra.mrb[16].mxu0 %vm130_vm0, %v2255_v25 }
  0x2b   :  { %753 = vmatpush1.bf16.msra.mxu0 %v2756_v26  ;;  %278 = vmatprep.mubr.bf16.mxu1 %v3655_v1 }
  0x2c   :  { %754 = vmatprep.subr.bf16.mxu0 %v2762_v27  ;;  %391 = vmatprep.mubr.bf16.mxu0 %v3655_v1 }
  0x2f   :  { %755 = vmatpush1.bf16.msra.mxu0 %v2771_v28 }
  0x30   :  { %756 = vmatprep.subr.bf16.mxu0 %v2779_v29 }
  0x32   :  { %2087 = vmatmul.mubr.msk.bf16.gmra.mrb[20].mxu1 %vm130_vm0, %v2237_v12  ;;  %2095 = vmatmul.mubr.msk.bf16.gmra.mrb[20].mxu0 %vm130_vm0, %v2262_v30 }
  0x33   :  { %757 = vmatpush1.bf16.msra.mxu0 %v2788_v31  ;;  %434 = vmatprep.mubr.bf16.mxu1 %v3655_v1 }
  0x34   :  { %758 = vmatprep.subr.bf16.mxu0 %v2794_v32  ;;  %776 = vmatprep.mubr.bf16.mxu0 %v3655_v1 }
  0x37   :  { %759 = vmatpush1.bf16.msra.mxu0 %v2802_v33 }
  0x38   :  { %896 = vmatprep.subr.bf16.mxu0 %v2676_v13 }
  0x3a   :  { %2096 = vmatmul.mubr.msk.bf16.vlgmr.msra.gmra.mrb[24].mxu1 %vm130_vm0, %v2241_v14  ;;  %777 = vmatmul.mubr.bf16.vlgmr.msra.gmra.mrb[24].mxu0 %v2590_v36 }
  0x3b   :  { %788 = vmatpush1.bf16.msra.mxu1 %v2811_v34  ;;  %444 = vmatprep.mubr.bf16.mxu1 %v3655_v1 }
  0x3c   :  { %789 = vmatprep.subr.bf16.mxu1 %v2816_v35  ;;  %897 = vmatpush1.bf16.msra.mxu0 %v2689_v15 }
  0x3d   :  { %898 = vmatprep.subr.bf16.mxu0 %v2694_v16  ;;  %928 = vmatprep.mubr.bf16.mxu0 %v3655_v1 }
  0x3f   :  { %790 = vmatpush1.bf16.msra.mxu1 %v2824_v37 }
  0x40   :  { %791 = vmatprep.subr.bf16.mxu1 %v2831_v38  ;;  %899 = vmatpush1.bf16.msra.mxu0 %v2702_v17 }
  0x41   :  { %900 = vmatprep.subr.bf16.mxu0 %v2707_v18 }
  0x42   :  { %2097 = vmatmul.mubr.msk.bf16.gmra.mrb[28].mxu1 %vm130_vm0, %v2248_v20 }
  0x43   :  { %792 = vmatpush1.bf16.msra.mxu1 %v2840_v39  ;;  %454 = vmatprep.mubr.bf16.mxu1 %v3655_v1 }
  0x44   :  { %793 = vmatprep.subr.bf16.mxu1 %v2846_v40  ;;  %901 = vmatpush1.bf16.msra.mxu0 %v2724_v21 }
  0x45   :  { %902 = vmatprep.subr.bf16.mxu0 %v2730_v22 }
  0x47   :  { %794 = vmatpush1.bf16.msra.mxu1 %v2855_v41 }
  0x48   :  { %795 = vmatprep.subr.bf16.mxu1 %v2862_v42  ;;  %903 = vmatpush1.bf16.msra.mxu0 %v2739_v23 }
  0x49   :  { %904 = vmatprep.subr.bf16.mxu0 %v2747_v24 }
  0x4a   :  { %2098 = vmatmul.mubr.msk.bf16.gmra.mrb[32].mxu1 %vm130_vm0, %v2255_v25 }
  0x4b   :  { %796 = vmatpush1.bf16.msra.mxu1 %v2870_v43  ;;  %464 = vmatprep.mubr.bf16.mxu1 %v3655_v1 }
  0x4c   :  { %797 = vmatprep.subr.bf16.mxu1 %v2876_v44  ;;  %905 = vmatpush1.bf16.msra.mxu0 %v2756_v26 }
  0x4d   :  { %906 = vmatprep.subr.bf16.mxu0 %v2762_v27 }
  0x4f   :  { %798 = vmatpush1.bf16.msra.mxu1 %v2885_v45 }
  0x50   :  { %799 = vmatprep.subr.bf16.mxu1 %v2892_v46  ;;  %907 = vmatpush1.bf16.msra.mxu0 %v2771_v28 }
  0x51   :  { %908 = vmatprep.subr.bf16.mxu0 %v2779_v29 }
  0x52   :  { %2099 = vmatmul.mubr.msk.bf16.gmra.mrb[36].mxu1 %vm130_vm0, %v2262_v30 }
  0x53   :  { %800 = vmatpush1.bf16.msra.mxu1 %v2900_v47  ;;  %819 = vmatprep.mubr.bf16.mxu1 %v3655_v1 }
  0x54   :  { %801 = vmatprep.subr.bf16.mxu1 %v2906_v48  ;;  %909 = vmatpush1.bf16.msra.mxu0 %v2788_v31 }
  0x55   :  { %910 = vmatprep.subr.bf16.mxu0 %v2794_v32 }
  0x57   :  { %802 = vmatpush1.bf16.msra.mxu1 %v2915_v49 }
  0x58   :  { %939 = vmatprep.subr.bf16.mxu1 %v2714_v19  ;;  %911 = vmatpush1.bf16.msra.mxu0 %v2802_v33 }
  0x59   :  { %1048 = vmatprep.subr.bf16.mxu0 %v2676_v13 }
  0x5a   :  { %820 = vmatmul.mubr.bf16.vlgmr.msra.gmra.mrb[40].mxu1 %v2590_v36 }
  0x5b   :  { %940 = vmatpush1.bf16.msra.mxu1 %v2811_v34  ;;  %971 = vmatprep.mubr.bf16.mxu1 %v3655_v1 }
  0x5c   :  { %941 = vmatprep.subr.bf16.mxu1 %v2816_v35 }
  0x5f   :  { %942 = vmatpush1.bf16.msra.mxu1 %v2824_v37 }
  0x60   :  { %943 = vmatprep.subr.bf16.mxu1 %v2831_v38 }
  0x63   :  { %944 = vmatpush1.bf16.msra.mxu1 %v2840_v39 }
  0x64   :  { %945 = vmatprep.subr.bf16.mxu1 %v2846_v40 }
  0x67   :  { %946 = vmatpush1.bf16.msra.mxu1 %v2855_v41 }
  0x68   :  { %947 = vmatprep.subr.bf16.mxu1 %v2862_v42 }
  0x6b   :  { %948 = vmatpush1.bf16.msra.mxu1 %v2870_v43 }
  0x6c   :  { %949 = vmatprep.subr.bf16.mxu1 %v2876_v44 }
  0x6f   :  { %950 = vmatpush1.bf16.msra.mxu1 %v2885_v45 }
  0x70   :  { %951 = vmatprep.subr.bf16.mxu1 %v2892_v46 }
  0x73   :  { %952 = vmatpush1.bf16.msra.mxu1 %v2900_v47 }
  0x74   :  { %953 = vmatprep.subr.bf16.mxu1 %v2906_v48 }
  0x77   :  { %954 = vmatpush1.bf16.msra.mxu1 %v2915_v49 }
  0x78   :  { %1091 = vmatprep.subr.bf16.mxu1 %v2714_v19 }
  0xdd   :  { %v197_v57 = vpop.f32.mrb[0].mxu1  ;;  %v2949_v58 = vpop.f32.mrb[0].mxu0 }
  0xde   :  { %v2952_v59 = vadd.f32 %v197_v57, %v2945_v55  ;;  %v199_v60 = vpop.f32.mrb[1].mxu1  ;;  %v2954_v61 = vpop.f32.mrb[1].mxu0 }
  0xdf   :  { %v2957_v62 = vadd.f32 %v199_v60, %v2947_v56  ;;  %v201_v63 = vpop.f32.mrb[2].mxu1  ;;  %v181_v0 = vpop.f32.mrb[2].mxu0 }
  0xe0   :  { %3657 = vst [vmem:[#allocation5_spill] sm:$0xff] %v2952_v59  ;;  %v2960_v2 = vadd.f32 %v201_v63, %v2945_v55  ;;  %v203_v3 = vpop.f32.mrb[3].mxu1  ;;  %v2963_v4 = vadd.f32 %v181_v0, %v2945_v55  ;;  %v183_v5 = vpop.f32.mrb[3].mxu0  ;;  %v60_v0 = vsub.s32 2, %v51_v51 }
  0xe1   :  { %3658 = vst [vmem:[#allocation6_spill] sm:$0xff] %v2957_v62  ;;  %v2966_v6 = vadd.f32 %v203_v3, %v2947_v56  ;;  %v2969_v7 = vadd.f32 %v183_v5, %v2947_v56  ;;  %v64_v3 = vsub.s32 3, %v51_v51 }
  0xe2   :  { %3659 = vst [vmem:[#allocation7_spill] sm:$0xff] %v2960_v2 }
  0xe3   :  { %3660 = vst [vmem:[#allocation8_spill] sm:$0xff] %v2966_v6 }
  0xe5   :  { %v207_v8 = vpop.f32.mrb[4].mxu1  ;;  %v187_v9 = vpop.f32.mrb[4].mxu0 }
  0xe6   :  { %v2972_v10 = vadd.f32 %v207_v8, %v2945_v55  ;;  %v209_v11 = vpop.f32.mrb[5].mxu1  ;;  %v2975_v12 = vadd.f32 %v187_v9, %v2945_v55  ;;  %v189_v14 = vpop.f32.mrb[5].mxu0  ;;  %v2999_v9 = vrot.slane %v32_v53, %v60_v0 }
  0xe7   :  { %v2978_v20 = vadd.f32 %v209_v11, %v2947_v56  ;;  %v211_v25 = vpop.f32.mrb[6].mxu1  ;;  %v2981_v30 = vadd.f32 %v189_v14, %v2947_v56  ;;  %v191_v36 = vpop.f32.mrb[6].mxu0 }
  0xe8   :  { %3661 = vst [vmem:[#allocation9_spill] sm:$0xff] %v2972_v10  ;;  %3662 = vst [vmem:[#allocation10_spill] sm:$0xff] %v2975_v12  ;;  %v2984_v50 = vadd.f32 %v211_v25, %v2945_v55  ;;  %v213_v52 = vpop.f32.mrb[7].mxu1  ;;  %v2987_v54 = vadd.f32 %v191_v36, %v2945_v55  ;;  %v193_v57 = vpop.f32.mrb[7].mxu0  ;;  %v3005_v25 = vrot.slane %v32_v53, %v64_v3 }
  0xe9   :  { %3663 = vst [vmem:[#allocation11_spill] sm:$0xff] %v2978_v20  ;;  %3664 = vst [vmem:[#allocation12_spill] sm:$0xff] %v2981_v30  ;;  %v2990_v60 = vadd.f32 %v213_v52, %v2947_v56  ;;  %v2993_v63 = vadd.f32 %v193_v57, %v2947_v56 }
  0xea   :  { %3665 = vst [vmem:[#allocation13_spill] sm:$0xff] %v2984_v50  ;;  %3666 = vst [vmem:[#allocation14_spill] sm:$0xff] %v2987_v54 }
  0xeb   :  { %3667 = vst [vmem:[#allocation15_spill] sm:$0xff] %v2990_v60  ;;  %3668 = vst [vmem:[#allocation16_spill] sm:$0xff] %v2993_v63 }
  0xed   :  { %v2995_v5 = vpop.f32.mrb[8].mxu1  ;;  %v2997_v8 = vpop.f32.mrb[8].mxu0 }
  0xee   :  { %v3001_v11 = vpop.f32.mrb[9].mxu1  ;;  %v3003_v14 = vpop.f32.mrb[9].mxu0 }
  0xef   :  { %v254_v36 = vpop.f32.mrb[10].mxu1  ;;  %v367_v52 = vpop.f32.mrb[10].mxu0 }
  0xf0   :  { %v3008_v1 = vadd.f32 %v254_v36, %v2999_v9  ;;  %v256_v57 = vpop.f32.mrb[11].mxu1  ;;  %v3011_v51 = vadd.f32 %v367_v52, %v2945_v55  ;;  %v369_v60 = vpop.f32.mrb[11].mxu0 }
  0xf1   :  { %v3014_v50 = vadd.f32 %v256_v57, %v3005_v25  ;;  %v3017_v0 = vadd.f32 %v369_v60, %v2947_v56 }
  0xf5   :  { %v260_v20 = vpop.f32.mrb[12].mxu1  ;;  %v373_v10 = vpop.f32.mrb[12].mxu0 }
  0xf6   :  { %v3020_v53 = vadd.f32 %v260_v20, %v2999_v9  ;;  %v262_v3 = vpop.f32.mrb[13].mxu1  ;;  %v3023_v36 = vadd.f32 %v373_v10, %v2945_v55  ;;  %v375_v6 = vpop.f32.mrb[13].mxu0 }
  0xf7   :  { %v3026_v52 = vadd.f32 %v262_v3, %v3005_v25  ;;  %v264_v2 = vpop.f32.mrb[14].mxu1  ;;  %v3029_v57 = vadd.f32 %v375_v6, %v2947_v56  ;;  %v377_v62 = vpop.f32.mrb[14].mxu0 }
  0xf8   :  { %3669 = vst [vmem:[#allocation17_spill] sm:$0xff] %v3020_v53  ;;  %3670 = vst [vmem:[#allocation18_spill] sm:$0xff] %v3023_v36  ;;  %v3032_v60 = vadd.f32 %v264_v2, %v2999_v9  ;;  %v266_v59 = vpop.f32.mrb[15].mxu1  ;;  %v3035_v20 = vadd.f32 %v377_v62, %v2945_v55  ;;  %v379_v63 = vpop.f32.mrb[15].mxu0 }
  0xf9   :  { %3671 = vst [vmem:[#allocation19_spill] sm:$0xff] %v3026_v52  ;;  %3672 = vst [vmem:[#allocation20_spill] sm:$0xff] %v3029_v57  ;;  %v3038_v10 = vadd.f32 %v266_v59, %v3005_v25  ;;  %v3041_v54 = vadd.f32 %v379_v63, %v2947_v56 }
  0xfa   :  { %3673 = vst [vmem:[#allocation21_spill] sm:$0xff] %v3032_v60  ;;  %3674 = vst [vmem:[#allocation22_spill] sm:$0xff] %v3035_v20 }
  0xfb   :  { %3675 = vst [vmem:[#allocation23_spill] sm:$0xff] %v3038_v10  ;;  %3676 = vst [vmem:[#allocation24_spill] sm:$0xff] %v3041_v54 }
  0xfd   :  { %v270_v3 = vpop.f32.mrb[16].mxu1  ;;  %v383_v36 = vpop.f32.mrb[16].mxu0 }
  0xfe   :  { %v3044_v6 = vadd.f32 %v270_v3, %v2999_v9  ;;  %v272_v57 = vpop.f32.mrb[17].mxu1  ;;  %v3047_v2 = vadd.f32 %v383_v36, %v2945_v55  ;;  %v385_v60 = vpop.f32.mrb[17].mxu0 }
  0xff   :  { %v3050_v62 = vadd.f32 %v272_v57, %v3005_v25  ;;  %v274_v20 = vpop.f32.mrb[18].mxu1  ;;  %v3053_v59 = vadd.f32 %v385_v60, %v2947_v56  ;;  %v387_v10 = vpop.f32.mrb[18].mxu0 }
 0x100   :  { %3677 = vst [vmem:[#allocation25_spill] sm:$0xff] %v3044_v6  ;;  %3678 = vst [vmem:[#allocation26_spill] sm:$0xff] %v3047_v2  ;;  %v3056_v63 = vadd.f32 %v274_v20, %v2999_v9  ;;  %v276_v54 = vpop.f32.mrb[19].mxu1  ;;  %v3059_v3 = vadd.f32 %v387_v10, %v2945_v55  ;;  %v389_v6 = vpop.f32.mrb[19].mxu0 }
 0x101   :  { %3679 = vst [vmem:[#allocation27_spill] sm:$0xff] %v3050_v62  ;;  %3680 = vst [vmem:[#allocation28_spill] sm:$0xff] %v3053_v59  ;;  %v3062_v36 = vadd.f32 %v276_v54, %v3005_v25  ;;  %v3065_v2 = vadd.f32 %v389_v6, %v2947_v56 }
 0x102   :  { %3681 = vst [vmem:[#allocation29_spill] sm:$0xff] %v3056_v63  ;;  %3682 = vst [vmem:[#allocation30_spill] sm:$0xff] %v3059_v3 }
 0x103   :  { %3683 = vst [vmem:[#allocation31_spill] sm:$0xff] %v3062_v36  ;;  %3684 = vst [vmem:[#allocation32_spill] sm:$0xff] %v3065_v2 }
 0x105   :  { %v280_v57 = vpop.f32.mrb[20].mxu1  ;;  %v393_v62 = vpop.f32.mrb[20].mxu0 }
 0x106   :  { %v3068_v60 = vadd.f32 %v280_v57, %v2999_v9  ;;  %v282_v59 = vpop.f32.mrb[21].mxu1  ;;  %v3071_v20 = vadd.f32 %v393_v62, %v2945_v55  ;;  %v395_v63 = vpop.f32.mrb[21].mxu0 }
 0x107   :  { %v3074_v10 = vadd.f32 %v282_v59, %v3005_v25  ;;  %v284_v3 = vpop.f32.mrb[22].mxu1  ;;  %v3077_v54 = vadd.f32 %v395_v63, %v2947_v56  ;;  %v397_v36 = vpop.f32.mrb[22].mxu0  ;;  %v178_v59 = vadd.f32 %v2949_v58, %v2945_v55  ;;  %v180_v63 = vadd.f32 %v2954_v61, %v2947_v56 }
 0x108   :  { %3685 = vst [vmem:[#allocation33_spill] sm:$0xff] %v3068_v60  ;;  %3686 = vst [vmem:[#allocation34_spill] sm:$0xff] %v3071_v20  ;;  %v3080_v6 = vadd.f32 %v284_v3, %v2999_v9  ;;  %v286_v2 = vpop.f32.mrb[23].mxu1  ;;  %v3083_v57 = vadd.f32 %v397_v36, %v2945_v55  ;;  %v399_v60 = vpop.f32.mrb[23].mxu0 }
 0x109   :  { %3687 = vst [vmem:[#allocation35_spill] sm:$0xff] %v3074_v10  ;;  %3688 = vst [vmem:[#allocation36_spill] sm:$0xff] %v3077_v54  ;;  %v3086_v62 = vadd.f32 %v286_v2, %v3005_v25  ;;  %v3089_v20 = vadd.f32 %v399_v60, %v2947_v56  ;;  %v366_v2 = vadd.f32 %v3003_v14, %v2947_v56 }
 0x10a   :  { %3689 = vst [vmem:[#allocation37_spill] sm:$0xff] %v3080_v6  ;;  %3690 = vst [vmem:[#allocation38_spill] sm:$0xff] %v3083_v57  ;;  %v364_v6 = vadd.f32 %v2997_v8, %v2945_v55 }
 0x10b   :  { %3691 = vst [vmem:[#allocation39_spill] sm:$0xff] %v3086_v62  ;;  %3692 = vst [vmem:[#allocation40_spill] sm:$0xff] %v3089_v20 }
 0x10d   :  { %v436_v54 = vpop.f32.mrb[24].mxu1  ;;  %v778_v3 = vpop.f32.mrb[24].mxu0 }
 0x10e   :  { %v830_v36 = vadd.f32 %v778_v3, %v178_v59  ;;  %v438_v57 = vpop.f32.mrb[25].mxu1  ;;  %v780_v10 = vpop.f32.mrb[25].mxu0 }
 0x10f   :  { %v831_v62 = vadd.f32 %v780_v10, %v180_v63  ;;  %v440_v60 = vpop.f32.mrb[26].mxu1  ;;  %v782_v20 = vpop.f32.mrb[26].mxu0 }
 0x110   :  { %v3100_v52 = vadd.f32 %v440_v60, %v2999_v9  ;;  %v834_v58 = vadd.f32 %v782_v20, %v364_v6  ;;  %v442_v30 = vpop.f32.mrb[27].mxu1  ;;  %v784_v61 = vpop.f32.mrb[27].mxu0  ;;  %v2132_v10 = vmul.f32 -1.442695, %v830_v36 }
 0x111   :  { %v3103_v53 = vadd.f32 %v442_v30, %v3005_v25  ;;  %v835_v12 = vadd.f32 %v784_v61, %v366_v2  ;;  %v2133_v6 = vmul.f32 -1.442695, %v831_v62 }
 0x112   :  { %v2135_v30 = vmul.f32 -1.442695, %v834_v58  ;;  %2301 = vpow2.f32 %v2132_v10 }
 0x113   :  { %v2136_v2 = vmul.f32 -1.442695, %v835_v12  ;;  %2303 = vpow2.f32 %v2133_v6 }
 0x114   :  { %2305 = vpow2.f32 %v2135_v30 }
 0x115   :  { %v446_v55 = vpop.f32.mrb[28].mxu1  ;;  %2307 = vpow2.f32 %v2136_v2 }
 0x116   :  { %v3106_v8 = vadd.f32 %v446_v55, %v2999_v9  ;;  %v448_v59 = vpop.f32.mrb[29].mxu1 }
 0x117   :  { %v3109_v56 = vadd.f32 %v448_v59, %v3005_v25  ;;  %v450_v14 = vpop.f32.mrb[30].mxu1 }
 0x118   :  { %v3112_v63 = vadd.f32 %v450_v14, %v2999_v9  ;;  %v452_v20 = vpop.f32.mrb[31].mxu1 }
 0x119   :  { %v3115_v3 = vadd.f32 %v452_v20, %v3005_v25 }
 0x11a   :  { %3693 = vst [vmem:[#allocation41_spill] sm:$0xff] %v3112_v63 }
 0x11b   :  { %3694 = vst [vmem:[#allocation42_spill] sm:$0xff] %v3115_v3 }
 0x11c   :  { %v2302_v10 = vpop.eup %2301 }
 0x11d   :  { %v456_v60 = vpop.f32.mrb[32].mxu1  ;;  %v2304_v30 = vpop.eup %2303 }
 0x11e   :  { %v3118_v61 = vadd.f32 %v456_v60, %v2999_v9  ;;  %v458_v55 = vpop.f32.mrb[33].mxu1 }
 0x11f   :  { %v3121_v36 = vadd.f32 %v458_v55, %v3005_v25  ;;  %v460_v59 = vpop.f32.mrb[34].mxu1  ;;  %v2306_v55 = vpop.eup %2305 }
 0x120   :  { %3695 = vst [vmem:[#allocation43_spill] sm:$0xff] %v3118_v61  ;;  %v3124_v62 = vadd.f32 %v460_v59, %v2999_v9  ;;  %v462_v14 = vpop.f32.mrb[35].mxu1  ;;  %v856_v61 = vadd.f32 1.0, %v2302_v10  ;;  %v859_v3 = vadd.f32 1.0, %v2306_v55  ;;  %v439_v10 = vadd.f32 %v438_v57, %v3005_v25 }
 0x121   :  { %3696 = vst [vmem:[#allocation44_spill] sm:$0xff] %v3121_v36  ;;  %v3127_v58 = vadd.f32 %v462_v14, %v3005_v25 }
 0x122   :  { %3697 = vst [vmem:[#allocation45_spill] sm:$0xff] %v3124_v62  ;;  %v2308_v62 = vpop.eup %2307  ;;  %2309 = vrcp.f32 %v856_v61 }
 0x123   :  { %3698 = vst [vmem:[#allocation46_spill] sm:$0xff] %v3127_v58  ;;  %v857_v58 = vadd.f32 1.0, %v2304_v30 }
 0x125   :  { %v466_v12 = vpop.f32.mrb[36].mxu1  ;;  %2311 = vrcp.f32 %v857_v58 }
 0x126   :  { %v3130_v20 = vadd.f32 %v466_v12, %v2999_v9  ;;  %v468_v6 = vpop.f32.mrb[37].mxu1  ;;  %v251_v12 = vadd.f32 %v2995_v5, %v2999_v9  ;;  %2313 = vrcp.f32 %v859_v3 }
 0x127   :  { %v3133_v2 = vadd.f32 %v468_v6, %v3005_v25  ;;  %v470_v60 = vpop.f32.mrb[38].mxu1  ;;  %v253_v6 = vadd.f32 %v3001_v11, %v3005_v25 }
 0x128   :  { %3699 = vst [vmem:[#allocation47_spill] sm:$0xff] %v3130_v20  ;;  %v3136_v36 = vadd.f32 %v470_v60, %v2999_v9  ;;  %v472_v59 = vpop.f32.mrb[39].mxu1  ;;  %v860_v20 = vadd.f32 1.0, %v2308_v62  ;;  %v437_v60 = vadd.f32 %v436_v54, %v2999_v9 }
 0x129   :  { %3700 = vst [vmem:[#allocation48_spill] sm:$0xff] %v3133_v2  ;;  %v3139_v14 = vadd.f32 %v472_v59, %v3005_v25 }
 0x12a   :  { %3701 = vst [vmem:[#allocation49_spill] sm:$0xff] %v3136_v36  ;;  %2315 = vrcp.f32 %v860_v20 }
 0x12b   :  { %3702 = vst [vmem:[#allocation50_spill] sm:$0xff] %v3139_v14 }
 0x12c   :  { %v2310_v61 = vpop.eup %2309 }
 0x12d   :  { %v821_v2 = vpop.f32.mrb[40].mxu1 }
 0x12e   :  { %v832_v36 = vadd.f32 %v821_v2, %v251_v12  ;;  %v823_v63 = vpop.f32.mrb[41].mxu1 }
 0x12f   :  { %v833_v59 = vadd.f32 %v823_v63, %v253_v6  ;;  %v825_v30 = vpop.f32.mrb[42].mxu1  ;;  %v2312_v9 = vpop.eup %2311 }
 0x130   :  { %v2134_v55 = vmul.f32 -1.442695, %v832_v36  ;;  %v836_v14 = vadd.f32 %v825_v30, %v437_v60  ;;  %v827_v5 = vpop.f32.mrb[43].mxu1  ;;  %v2314_v54 = vpop.eup %2313  ;;  %v876_v25 = vmul.f32 0.0, %v2312_v9  ;;  %v3703_v9 = vmov 0  }
 0x131   :  { %2317 = vtanh.f32 %v833_v59  ;;  %v837_v62 = vadd.f32 %v827_v5, %v439_v10 }
 0x132   :  { %2319 = vpow2.f32 %v2134_v55  ;;  %v2137_v11 = vmul.f32 -1.442695, %v836_v14 }
 0x133   :  { %2321 = vtanh.f32 %v837_v62 }
 0x134   :  { %2323 = vpow2.f32 %v2137_v11  ;;  %v2316_v58 = vpop.eup %2315 }
 0x135   :  { %v877_v36 = vmul.f32 0.0, %v2316_v58 }
 0x13b   :  { %v2318_v2 = vpop.eup %2317 }
 0x13c   :  { %v2320_v12 = vpop.eup %2319  ;;  %v878_v57 = vmul.f32 %v2318_v2, %v2310_v61 }
 0x13d   :  { %v2322_v63 = vpop.eup %2321  ;;  %v858_v3 = vadd.f32 1.0, %v2320_v12 }
 0x13e   :  { %v2324_v20 = vpop.eup %2323  ;;  %v3147_v6 = vadd.f32 %v878_v57, %v876_v25  ;;  %v879_v60 = vmul.f32 %v2322_v63, %v2314_v54 }
 0x13f   :  { %2325 = vrcp.f32 %v858_v3  ;;  %v861_v10 = vadd.f32 1.0, %v2324_v20 }
 0x140   :  { %2327 = vtanh.f32 %v3147_v6  ;;  %v3150_v14 = vadd.f32 %v879_v60, %v877_v36 }
 0x141   :  { %2329 = vrcp.f32 %v861_v10 }
 0x142   :  { %2331 = vtanh.f32 %v3150_v14 }
 0x149   :  { %v2326_v59 = vpop.eup %2325 }
 0x14a   :  { %v2328_v30 = vpop.eup %2327 }
 0x14b   :  { %v2330_v55 = vpop.eup %2329  ;;  %v884_v62 = vmul.f32 %v2328_v30, %v2326_v59 }
 0x14c   :  { %v2332_v5 = vpop.eup %2331 }
 0x14d   :  { %v885_v11 = vmul.f32 %v2332_v5, %v2330_v55 }
 0x14f   :  { %v895_v61 = vpack.c.bf16 %v885_v11, %v884_v62 }
 0x151   :  { %929 = vmatmul.mubr.bf16.vlgmr.msra.gmra.mrb[28].mxu0 %v895_v61  ;;  %972 = vmatmul.mubr.bf16.vlgmr.msra.gmra.mrb[44].mxu1 %v895_v61 }
 0x152   :  { %1049 = vmatpush1.bf16.msra.mxu0 %v2689_v15  ;;  %1092 = vmatpush1.bf16.msra.mxu1 %v2811_v34 }
 0x153   :  { %1050 = vmatprep.subr.bf16.mxu0 %v2694_v16  ;;  %1093 = vmatprep.subr.bf16.mxu1 %v2816_v35 }
 0x154   :  { %1080 = vmatprep.mubr.bf16.mxu0 %v3703_v9  ;;  %1123 = vmatprep.mubr.bf16.mxu1 %v3703_v9 }
 0x156   :  { %1051 = vmatpush1.bf16.msra.mxu0 %v2702_v17  ;;  %1094 = vmatpush1.bf16.msra.mxu1 %v2824_v37 }
 0x157   :  { %1052 = vmatprep.subr.bf16.mxu0 %v2707_v18  ;;  %1095 = vmatprep.subr.bf16.mxu1 %v2831_v38 }
 0x15a   :  { %1053 = vmatpush1.bf16.msra.mxu0 %v2724_v21  ;;  %1096 = vmatpush1.bf16.msra.mxu1 %v2840_v39 }
 0x15b   :  { %1054 = vmatprep.subr.bf16.mxu0 %v2730_v22  ;;  %1097 = vmatprep.subr.bf16.mxu1 %v2846_v40 }
 0x15e   :  { %1055 = vmatpush1.bf16.msra.mxu0 %v2739_v23  ;;  %1098 = vmatpush1.bf16.msra.mxu1 %v2855_v41 }
 0x15f   :  { %1056 = vmatprep.subr.bf16.mxu0 %v2747_v24  ;;  %1099 = vmatprep.subr.bf16.mxu1 %v2862_v42 }
 0x162   :  { %1057 = vmatpush1.bf16.msra.mxu0 %v2756_v26  ;;  %1100 = vmatpush1.bf16.msra.mxu1 %v2870_v43 }
 0x163   :  { %1058 = vmatprep.subr.bf16.mxu0 %v2762_v27  ;;  %1101 = vmatprep.subr.bf16.mxu1 %v2876_v44 }
 0x166   :  { %1059 = vmatpush1.bf16.msra.mxu0 %v2771_v28  ;;  %1102 = vmatpush1.bf16.msra.mxu1 %v2885_v45 }
 0x167   :  { %1060 = vmatprep.subr.bf16.mxu0 %v2779_v29  ;;  %1103 = vmatprep.subr.bf16.mxu1 %v2892_v46 }
 0x16a   :  { %1061 = vmatpush1.bf16.msra.mxu0 %v2788_v31  ;;  %1104 = vmatpush1.bf16.msra.mxu1 %v2900_v47 }
 0x16b   :  { %1062 = vmatprep.subr.bf16.mxu0 %v2794_v32  ;;  %1105 = vmatprep.subr.bf16.mxu1 %v2906_v48 }
 0x16e   :  { %1063 = vmatpush1.bf16.msra.mxu0 %v2802_v33  ;;  %1106 = vmatpush1.bf16.msra.mxu1 %v2915_v49 }
 0x16f   :  { %1200 = vmatprep.subr.bf16.mxu0 %v2676_v13  ;;  %1243 = vmatprep.subr.bf16.mxu1 %v2714_v19 }
 0x224   :  { %v930_v54 = vpop.f32.mrb[28].mxu0  ;;  %v973_v58 = vpop.f32.mrb[44].mxu1 }
 0x225   :  { %v982_v2 = vadd.f32 %v930_v54, %v2963_v4  ;;  %v984_v12 = vadd.f32 %v973_v58, %v3008_v1  ;;  %v932_v25 = vpop.f32.mrb[29].mxu0  ;;  %v975_v57 = vpop.f32.mrb[45].mxu1 }
 0x226   :  { %v983_v63 = vadd.f32 %v932_v25, %v2969_v7  ;;  %v985_v3 = vadd.f32 %v975_v57, %v3014_v50  ;;  %v934_v20 = vpop.f32.mrb[30].mxu0  ;;  %v977_v36 = vpop.f32.mrb[46].mxu1 }
 0x227   :  { %v2138_v60 = vmul.f32 -1.442695, %v982_v2  ;;  %v986_v10 = vadd.f32 %v934_v20, %v3011_v51  ;;  %v988_v13 = vadd.f32 %v977_v36, %v3100_v52  ;;  %v936_v59 = vpop.f32.mrb[31].mxu0  ;;  %v979_v30 = vpop.f32.mrb[47].mxu1  ;;  %v2140_v7 = vmul.f32 -1.442695, %v984_v12 }
 0x228   :  { %v2139_v55 = vmul.f32 -1.442695, %v983_v63  ;;  %v987_v4 = vadd.f32 %v936_v59, %v3017_v0  ;;  %v989_v1 = vadd.f32 %v979_v30, %v3103_v53 }
 0x229   :  { %2333 = vpow2.f32 %v2138_v60  ;;  %v2141_v5 = vmul.f32 -1.442695, %v986_v10  ;;  %v2143_v50 = vmul.f32 -1.442695, %v988_v13 }
 0x22a   :  { %v2142_v62 = vmul.f32 -1.442695, %v987_v4  ;;  %2335 = vpow2.f32 %v2139_v55 }
 0x22b   :  { %2337 = vpow2.f32 %v2141_v5 }
 0x22c   :  { %2339 = vpow2.f32 %v2142_v62 }
 0x22d   :  { %2341 = vtanh.f32 %v985_v3 }
 0x22e   :  { %2343 = vpow2.f32 %v2140_v7 }
 0x22f   :  { %2345 = vpow2.f32 %v2143_v50 }
 0x233   :  { %v2334_v11 = vpop.eup %2333 }
 0x234   :  { %v1008_v51 = vadd.f32 1.0, %v2334_v11  ;;  %v2336_v52 = vpop.eup %2335 }
 0x235   :  { %v2338_v61 = vpop.eup %2337  ;;  %v1009_v54 = vadd.f32 1.0, %v2336_v52  ;;  %v3708_v52 = vld [vmem:[#allocation18_spill] sm:$0xff] }
 0x236   :  { %2347 = vrcp.f32 %v1008_v51  ;;  %v1011_v0 = vadd.f32 1.0, %v2338_v61  ;;  %v2340_v53 = vpop.eup %2339 }
 0x237   :  { %2349 = vtanh.f32 %v989_v1  ;;  %v1012_v58 = vadd.f32 1.0, %v2340_v53  ;;  %v2342_v2 = vpop.eup %2341 }
 0x238   :  { %2351 = vrcp.f32 %v1009_v54  ;;  %v2344_v25 = vpop.eup %2343 }
 0x239   :  { %2353 = vrcp.f32 %v1011_v0  ;;  %v2346_v12 = vpop.eup %2345  ;;  %v1010_v60 = vadd.f32 1.0, %v2344_v25 }
 0x23a   :  { %2355 = vrcp.f32 %v1012_v58  ;;  %v1013_v55 = vadd.f32 1.0, %v2346_v12  ;;  %v3709_v58 = vld [vmem:[#allocation20_spill] sm:$0xff] }
 0x23b   :  { %2357 = vrcp.f32 %v1010_v60 }
 0x240   :  { %v2348_v57 = vpop.eup %2347 }
 0x241   :  { %v2350_v63 = vpop.eup %2349  ;;  %v1030_v3 = vmul.f32 %v2348_v57, %v2342_v2 }
 0x242   :  { %v2352_v20 = vpop.eup %2351 }
 0x243   :  { %v2354_v36 = vpop.eup %2353  ;;  %v1028_v10 = vmul.f32 %v2352_v20, %v3147_v6 }
 0x244   :  { %v1031_v13 = vmul.f32 %v2354_v36, %v2350_v63  ;;  %v2356_v59 = vpop.eup %2355 }
 0x245   :  { %v3196_v30 = vadd.f32 %v1030_v3, %v1028_v10  ;;  %v1029_v4 = vmul.f32 %v2356_v59, %v3150_v14  ;;  %v2358_v5 = vpop.eup %2357 }
 0x247   :  { %2359 = vtanh.f32 %v3196_v30  ;;  %v3200_v1 = vadd.f32 %v1031_v13, %v1029_v4 }
 0x248   :  { %2361 = vrcp.f32 %v1013_v55 }
 0x249   :  { %2363 = vtanh.f32 %v3200_v1 }
 0x251   :  { %v2360_v62 = vpop.eup %2359 }
 0x252   :  { %v2362_v7 = vpop.eup %2361  ;;  %v1036_v6 = vmul.f32 %v2360_v62, %v2358_v5 }
 0x253   :  { %v2364_v50 = vpop.eup %2363 }
 0x254   :  { %v1037_v11 = vmul.f32 %v2364_v50, %v2362_v7 }
 0x256   :  { %v1047_v51 = vpack.c.bf16 %v1037_v11, %v1036_v6 }
 0x258   :  { %1081 = vmatmul.mubr.bf16.vlgmr.msra.gmra.mrb[32].mxu0 %v1047_v51  ;;  %1124 = vmatmul.mubr.bf16.vlgmr.msra.gmra.mrb[48].mxu1 %v1047_v51 }
 0x259   :  { %1201 = vmatpush1.bf16.msra.mxu0 %v2689_v15  ;;  %1244 = vmatpush1.bf16.msra.mxu1 %v2811_v34  ;;  %v3238_v15 = vld [vmem:[%s3651_s3 + $0x4] ss:$16 sps:$4 sm:$0xff]  }
 0x25a   :  { %1202 = vmatprep.subr.bf16.mxu0 %v2694_v16  ;;  %1245 = vmatprep.subr.bf16.mxu1 %v2816_v35 }
 0x25b   :  { %1232 = vmatprep.mubr.bf16.mxu0 %v3703_v9  ;;  %1275 = vmatprep.mubr.bf16.mxu1 %v3703_v9 }
 0x25d   :  { %1203 = vmatpush1.bf16.msra.mxu0 %v2702_v17  ;;  %1246 = vmatpush1.bf16.msra.mxu1 %v2824_v37 }
 0x25e   :  { %1204 = vmatprep.subr.bf16.mxu0 %v2707_v18  ;;  %1247 = vmatprep.subr.bf16.mxu1 %v2831_v38  ;;  %v3704_v18 = vld [vmem:[#allocation10_spill] sm:$0xff] }
 0x261   :  { %1205 = vmatpush1.bf16.msra.mxu0 %v2724_v21  ;;  %1248 = vmatpush1.bf16.msra.mxu1 %v2840_v39 }
 0x262   :  { %1206 = vmatprep.subr.bf16.mxu0 %v2730_v22  ;;  %1249 = vmatprep.subr.bf16.mxu1 %v2846_v40  ;;  %v3705_v22 = vld [vmem:[#allocation17_spill] sm:$0xff] }
 0x265   :  { %1207 = vmatpush1.bf16.msra.mxu0 %v2739_v23  ;;  %1250 = vmatpush1.bf16.msra.mxu1 %v2855_v41 }
 0x266   :  { %1208 = vmatprep.subr.bf16.mxu0 %v2747_v24  ;;  %1251 = vmatprep.subr.bf16.mxu1 %v2862_v42 }
 0x269   :  { %1209 = vmatpush1.bf16.msra.mxu0 %v2756_v26  ;;  %1252 = vmatpush1.bf16.msra.mxu1 %v2870_v43 }
 0x26a   :  { %1210 = vmatprep.subr.bf16.mxu0 %v2762_v27  ;;  %1253 = vmatprep.subr.bf16.mxu1 %v2876_v44  ;;  %v3706_v27 = vld [vmem:[#allocation12_spill] sm:$0xff] }
 0x26d   :  { %1211 = vmatpush1.bf16.msra.mxu0 %v2771_v28  ;;  %1254 = vmatpush1.bf16.msra.mxu1 %v2885_v45 }
 0x26e   :  { %1212 = vmatprep.subr.bf16.mxu0 %v2779_v29  ;;  %1255 = vmatprep.subr.bf16.mxu1 %v2892_v46  ;;  %v3707_v29 = vld [vmem:[#allocation19_spill] sm:$0xff] }
 0x271   :  { %1213 = vmatpush1.bf16.msra.mxu0 %v2788_v31  ;;  %1256 = vmatpush1.bf16.msra.mxu1 %v2900_v47 }
 0x272   :  { %1214 = vmatprep.subr.bf16.mxu0 %v2794_v32  ;;  %1257 = vmatprep.subr.bf16.mxu1 %v2906_v48 }
 0x275   :  { %1215 = vmatpush1.bf16.msra.mxu0 %v2802_v33  ;;  %1258 = vmatpush1.bf16.msra.mxu1 %v2915_v49 }
 0x276   :  { %1352 = vmatprep.subr.bf16.mxu0 %v3238_v15  ;;  %1395 = vmatprep.subr.bf16.mxu1 %v2714_v19 }
 0x32b   :  { %v1082_v16 = vpop.f32.mrb[32].mxu0  ;;  %v1125_v17 = vpop.f32.mrb[48].mxu1 }
 0x32c   :  { %v1134_v21 = vadd.f32 %v1082_v16, %v3704_v18  ;;  %v1136_v23 = vadd.f32 %v1125_v17, %v3705_v22  ;;  %v1084_v24 = vpop.f32.mrb[33].mxu0  ;;  %v1127_v26 = vpop.f32.mrb[49].mxu1 }
 0x32d   :  { %v1135_v28 = vadd.f32 %v1084_v24, %v3706_v27  ;;  %v1137_v31 = vadd.f32 %v1127_v26, %v3707_v29  ;;  %v1086_v32 = vpop.f32.mrb[34].mxu0  ;;  %v1129_v33 = vpop.f32.mrb[50].mxu1 }
 0x32e   :  { %v2144_v14 = vmul.f32 -1.442695, %v1134_v21  ;;  %v1138_v61 = vadd.f32 %v1086_v32, %v3708_v52  ;;  %v1140_v54 = vadd.f32 %v1129_v33, %v3106_v8  ;;  %v1088_v19 = vpop.f32.mrb[35].mxu0  ;;  %v1131_v0 = vpop.f32.mrb[51].mxu1  ;;  %v2146_v63 = vmul.f32 -1.442695, %v1136_v23 }
 0x32f   :  { %v2145_v53 = vmul.f32 -1.442695, %v1135_v28  ;;  %v1139_v2 = vadd.f32 %v1088_v19, %v3709_v58  ;;  %v1141_v25 = vadd.f32 %v1131_v0, %v3109_v56  ;;  %v3268_v33 = vld [vmem:[%s3651_s3 + $0x24] ss:$16 sps:$4 sm:$0xff]  }
 0x330   :  { %2365 = vpow2.f32 %v2144_v14  ;;  %v2147_v12 = vmul.f32 -1.442695, %v1138_v61  ;;  %v2149_v3 = vmul.f32 -1.442695, %v1140_v54  ;;  %v3277_v14 = vld [vmem:[%s3651_s3 + $0x20] ss:$16 sps:$4 sm:$0xff]  }
 0x331   :  { %v2148_v57 = vmul.f32 -1.442695, %v1139_v2  ;;  %2367 = vpow2.f32 %v2145_v53  ;;  %v3710_v61 = vld [vmem:[#allocation14_spill] sm:$0xff]  ;;  %v3711_v19 = vld [vmem:[#allocation21_spill] sm:$0xff]  ;;  %v3712_v2 = vld [vmem:[#allocation16_spill] sm:$0xff] }
 0x332   :  { %2369 = vpow2.f32 %v2147_v12 }
 0x333   :  { %2371 = vpow2.f32 %v2148_v57 }
 0x334   :  { %2373 = vtanh.f32 %v1137_v31 }
 0x335   :  { %2375 = vpow2.f32 %v2146_v63 }
 0x336   :  { %2377 = vpow2.f32 %v2149_v3 }
 0x33a   :  { %v2366_v20 = vpop.eup %2365 }
 0x33b   :  { %v1160_v36 = vadd.f32 1.0, %v2366_v20  ;;  %v2368_v8 = vpop.eup %2367  ;;  %v3714_v20 = vld [vmem:[#allocation22_spill] sm:$0xff] }
 0x33c   :  { %v2370_v60 = vpop.eup %2369  ;;  %v1161_v10 = vadd.f32 1.0, %v2368_v8  ;;  %v3715_v8 = vld [vmem:[#allocation41_spill] sm:$0xff] }
 0x33d   :  { %2379 = vrcp.f32 %v1160_v36  ;;  %v1163_v13 = vadd.f32 1.0, %v2370_v60  ;;  %v2372_v56 = vpop.eup %2371 }
 0x33e   :  { %2381 = vtanh.f32 %v1141_v25  ;;  %v1164_v59 = vadd.f32 1.0, %v2372_v56  ;;  %v2374_v55 = vpop.eup %2373 }
 0x33f   :  { %2383 = vrcp.f32 %v1161_v10  ;;  %v2376_v4 = vpop.eup %2375 }
 0x340   :  { %2385 = vrcp.f32 %v1163_v13  ;;  %v2378_v5 = vpop.eup %2377  ;;  %v1162_v51 = vadd.f32 1.0, %v2376_v4  ;;  %v3717_v4 = vld [vmem:[#allocation42_spill] sm:$0xff] }
 0x341   :  { %2387 = vrcp.f32 %v1164_v59  ;;  %v1165_v22 = vadd.f32 1.0, %v2378_v5  ;;  %v3716_v59 = vld [vmem:[#allocation24_spill] sm:$0xff] }
 0x342   :  { %2389 = vrcp.f32 %v1162_v51 }
 0x347   :  { %v2380_v62 = vpop.eup %2379 }
 0x348   :  { %v2382_v7 = vpop.eup %2381  ;;  %v1182_v50 = vmul.f32 %v2380_v62, %v2374_v55 }
 0x349   :  { %v2384_v6 = vpop.eup %2383 }
 0x34a   :  { %v2386_v11 = vpop.eup %2385  ;;  %v1180_v16 = vmul.f32 %v2384_v6, %v3196_v30 }
 0x34b   :  { %v1183_v17 = vmul.f32 %v2386_v11, %v2382_v7  ;;  %v2388_v18 = vpop.eup %2387 }
 0x34c   :  { %v3251_v21 = vadd.f32 %v1182_v50, %v1180_v16  ;;  %v1181_v23 = vmul.f32 %v2388_v18, %v3200_v1  ;;  %v2390_v26 = vpop.eup %2389  ;;  %v3261_v1 = vld [vmem:[%s3651_s3] ss:$16 sps:$4 sm:$0xff]  }
 0x34e   :  { %2391 = vtanh.f32 %v3251_v21  ;;  %v3255_v24 = vadd.f32 %v1183_v17, %v1181_v23 }
 0x34f   :  { %2393 = vrcp.f32 %v1165_v22 }
 0x350   :  { %2395 = vtanh.f32 %v3255_v24 }
 0x358   :  { %v2392_v27 = vpop.eup %2391 }
 0x359   :  { %v2394_v28 = vpop.eup %2393  ;;  %v1188_v30 = vmul.f32 %v2392_v27, %v2390_v26 }
 0x35a   :  { %v2396_v29 = vpop.eup %2395 }
 0x35b   :  { %v1189_v31 = vmul.f32 %v2396_v29, %v2394_v28 }
 0x35d   :  { %v1199_v32 = vpack.c.bf16 %v1189_v31, %v1188_v30 }
 0x35f   :  { %1233 = vmatmul.mubr.bf16.vlgmr.msra.gmra.mrb[36].mxu0 %v1199_v32  ;;  %1276 = vmatmul.mubr.bf16.vlgmr.msra.gmra.mrb[52].mxu1 %v1199_v32 }
 0x360   :  { %1353 = vmatpush1.bf16.msra.mxu0 %v3261_v1  ;;  %1396 = vmatpush1.bf16.msra.mxu1 %v2811_v34  ;;  %v3284_v34 = vld [vmem:[%s3651_s3 + $0x44] ss:$16 sps:$4 sm:$0xff]  }
 0x361   :  { %1354 = vmatprep.subr.bf16.mxu0 %v3268_v33  ;;  %1397 = vmatprep.subr.bf16.mxu1 %v2816_v35  ;;  %v3291_v35 = vld [vmem:[%s3651_s3 + $0x40] ss:$16 sps:$4 sm:$0xff]  }
 0x362   :  { %1384 = vmatprep.mubr.bf16.mxu0 %v3703_v9  ;;  %1427 = vmatprep.mubr.bf16.mxu1 %v3703_v9 }
 0x364   :  { %1355 = vmatpush1.bf16.msra.mxu0 %v3277_v14  ;;  %1398 = vmatpush1.bf16.msra.mxu1 %v2824_v37  ;;  %v3298_v37 = vld [vmem:[%s3651_s3 + $0x64] ss:$16 sps:$4 sm:$0xff]  }
 0x365   :  { %1356 = vmatprep.subr.bf16.mxu0 %v3284_v34  ;;  %1399 = vmatprep.subr.bf16.mxu1 %v2831_v38  ;;  %v3305_v38 = vld [vmem:[%s3651_s3 + $0x60] ss:$16 sps:$4 sm:$0xff]  }
 0x368   :  { %1357 = vmatpush1.bf16.msra.mxu0 %v3291_v35  ;;  %1400 = vmatpush1.bf16.msra.mxu1 %v2840_v39  ;;  %v3312_v39 = vld [vmem:[%s3651_s3 + $0x84] ss:$16 sps:$4 sm:$0xff]  }
 0x369   :  { %1358 = vmatprep.subr.bf16.mxu0 %v3298_v37  ;;  %1401 = vmatprep.subr.bf16.mxu1 %v2846_v40  ;;  %v3319_v40 = vld [vmem:[%s3651_s3 + $0x80] ss:$16 sps:$4 sm:$0xff]  }
 0x36c   :  { %1359 = vmatpush1.bf16.msra.mxu0 %v3305_v38  ;;  %1402 = vmatpush1.bf16.msra.mxu1 %v2855_v41  ;;  %v3326_v41 = vld [vmem:[%s3651_s3 + $0xa4] ss:$16 sps:$4 sm:$0xff]  }
 0x36d   :  { %1360 = vmatprep.subr.bf16.mxu0 %v3312_v39  ;;  %1403 = vmatprep.subr.bf16.mxu1 %v2862_v42  ;;  %v3333_v42 = vld [vmem:[%s3651_s3 + $0xa0] ss:$16 sps:$4 sm:$0xff]  }
 0x370   :  { %1361 = vmatpush1.bf16.msra.mxu0 %v3319_v40  ;;  %1404 = vmatpush1.bf16.msra.mxu1 %v2870_v43  ;;  %v3340_v43 = vld [vmem:[%s3651_s3 + $0xc4] ss:$16 sps:$4 sm:$0xff]  }
 0x371   :  { %1362 = vmatprep.subr.bf16.mxu0 %v3326_v41  ;;  %1405 = vmatprep.subr.bf16.mxu1 %v2876_v44  ;;  %v3347_v44 = vld [vmem:[%s3651_s3 + $0xc0] ss:$16 sps:$4 sm:$0xff]  }
 0x374   :  { %1363 = vmatpush1.bf16.msra.mxu0 %v3333_v42  ;;  %1406 = vmatpush1.bf16.msra.mxu1 %v2885_v45  ;;  %v3354_v45 = vld [vmem:[%s3651_s3 + $0xe4] ss:$16 sps:$4 sm:$0xff]  }
 0x375   :  { %1364 = vmatprep.subr.bf16.mxu0 %v3340_v43  ;;  %1407 = vmatprep.subr.bf16.mxu1 %v2892_v46  ;;  %v3361_v46 = vld [vmem:[%s3651_s3 + $0xe0] ss:$16 sps:$4 sm:$0xff]  }
 0x378   :  { %1365 = vmatpush1.bf16.msra.mxu0 %v3347_v44  ;;  %1408 = vmatpush1.bf16.msra.mxu1 %v2900_v47  ;;  %v3369_v47 = vld [vmem:[%s3651_s3 + $0xc] ss:$16 sps:$4 sm:$0xff]  }
 0x379   :  { %1366 = vmatprep.subr.bf16.mxu0 %v3354_v45  ;;  %1409 = vmatprep.subr.bf16.mxu1 %v2906_v48 }
 0x37c   :  { %1367 = vmatpush1.bf16.msra.mxu0 %v3361_v46  ;;  %1410 = vmatpush1.bf16.msra.mxu1 %v2915_v49  ;;  %v3713_v49 = vld [vmem:[#allocation23_spill] sm:$0xff] }
 0x37d   :  { %1504 = vmatprep.subr.bf16.mxu0 %v3238_v15  ;;  %1547 = vmatprep.subr.bf16.mxu1 %v3369_v47 }
 0x432   :  { %v1234_v52 = vpop.f32.mrb[36].mxu0  ;;  %v1277_v48 = vpop.f32.mrb[52].mxu1 }
 0x433   :  { %v1286_v54 = vadd.f32 %v1234_v52, %v3710_v61  ;;  %v1288_v0 = vadd.f32 %v1277_v48, %v3711_v19  ;;  %v1236_v53 = vpop.f32.mrb[37].mxu0  ;;  %v1279_v58 = vpop.f32.mrb[53].mxu1 }
 0x434   :  { %v1287_v25 = vadd.f32 %v1236_v53, %v3712_v2  ;;  %v1289_v12 = vadd.f32 %v1279_v58, %v3713_v49  ;;  %v1238_v57 = vpop.f32.mrb[38].mxu0  ;;  %v1281_v63 = vpop.f32.mrb[54].mxu1 }
 0x435   :  { %v2150_v3 = vmul.f32 -1.442695, %v1286_v54  ;;  %v1290_v36 = vadd.f32 %v1238_v57, %v3714_v20  ;;  %v1292_v60 = vadd.f32 %v1281_v63, %v3715_v8  ;;  %v1240_v10 = vpop.f32.mrb[39].mxu0  ;;  %v1283_v13 = vpop.f32.mrb[55].mxu1  ;;  %v2152_v50 = vmul.f32 -1.442695, %v1288_v0 }
 0x436   :  { %v2151_v56 = vmul.f32 -1.442695, %v1287_v25  ;;  %v1291_v55 = vadd.f32 %v1240_v10, %v3716_v59  ;;  %v1293_v5 = vadd.f32 %v1283_v13, %v3717_v4  ;;  %v3408_v8 = vld [vmem:[%s3651_s3 + $0x28] ss:$16 sps:$4 sm:$0xff]   ;;  %v3429_v13 = vld [vmem:[%s3651_s3 + $0x6c] ss:$16 sps:$4 sm:$0xff]  }
 0x437   :  { %2397 = vpow2.f32 %v2150_v3  ;;  %v2153_v62 = vmul.f32 -1.442695, %v1290_v36  ;;  %v2155_v6 = vmul.f32 -1.442695, %v1292_v60  ;;  %v3399_v36 = vld [vmem:[%s3651_s3 + $0x2c] ss:$16 sps:$4 sm:$0xff]  }
 0x438   :  { %v2154_v7 = vmul.f32 -1.442695, %v1291_v55  ;;  %2399 = vpow2.f32 %v2151_v56  ;;  %v3415_v60 = vld [vmem:[%s3651_s3 + $0x4c] ss:$16 sps:$4 sm:$0xff]   ;;  %v3422_v10 = vld [vmem:[%s3651_s3 + $0x48] ss:$16 sps:$4 sm:$0xff]  }
 0x439   :  { %2401 = vpow2.f32 %v2153_v62  ;;  %v3436_v56 = vld [vmem:[%s3651_s3 + $0x68] ss:$16 sps:$4 sm:$0xff]   ;;  %v3443_v59 = vld [vmem:[%s3651_s3 + $0x8c] ss:$16 sps:$4 sm:$0xff]  }
 0x43a   :  { %2403 = vpow2.f32 %v2154_v7  ;;  %v3450_v55 = vld [vmem:[%s3651_s3 + $0x88] ss:$16 sps:$4 sm:$0xff]   ;;  %v3457_v4 = vld [vmem:[%s3651_s3 + $0xac] ss:$16 sps:$4 sm:$0xff]  }
 0x43b   :  { %2405 = vtanh.f32 %v1289_v12  ;;  %v3471_v62 = vld [vmem:[%s3651_s3 + $0xcc] ss:$16 sps:$4 sm:$0xff]   ;;  %v3478_v7 = vld [vmem:[%s3651_s3 + $0xc8] ss:$16 sps:$4 sm:$0xff]  }
 0x43c   :  { %2407 = vpow2.f32 %v2152_v50  ;;  %v3485_v50 = vld [vmem:[%s3651_s3 + $0xec] ss:$16 sps:$4 sm:$0xff]  }
 0x43d   :  { %2409 = vpow2.f32 %v2155_v6  ;;  %v3492_v6 = vld [vmem:[%s3651_s3 + $0xe8] ss:$16 sps:$4 sm:$0xff]  }
 0x441   :  { %v2398_v11 = vpop.eup %2397 }
 0x442   :  { %v1312_v51 = vadd.f32 1.0, %v2398_v11  ;;  %v2400_v16 = vpop.eup %2399 }
 0x443   :  { %v2402_v17 = vpop.eup %2401  ;;  %v1313_v18 = vadd.f32 1.0, %v2400_v16  ;;  %v3718_v16 = vld [vmem:[#allocation5_spill] sm:$0xff] }
 0x444   :  { %2411 = vrcp.f32 %v1312_v51  ;;  %v1315_v22 = vadd.f32 1.0, %v2402_v17  ;;  %v2404_v23 = vpop.eup %2403 }
 0x445   :  { %2413 = vtanh.f32 %v1293_v5  ;;  %v1316_v26 = vadd.f32 1.0, %v2404_v23  ;;  %v2406_v27 = vpop.eup %2405  ;;  %v3464_v5 = vld [vmem:[%s3651_s3 + $0xa8] ss:$16 sps:$4 sm:$0xff]  }
 0x446   :  { %2415 = vrcp.f32 %v1313_v18  ;;  %v2408_v28 = vpop.eup %2407  ;;  %v3719_v18 = vld [vmem:[#allocation25_spill] sm:$0xff] }
 0x447   :  { %2417 = vrcp.f32 %v1315_v22  ;;  %v2410_v29 = vpop.eup %2409  ;;  %v1314_v61 = vadd.f32 1.0, %v2408_v28 }
 0x448   :  { %2419 = vrcp.f32 %v1316_v26  ;;  %v1317_v58 = vadd.f32 1.0, %v2410_v29  ;;  %v3721_v29 = vld [vmem:[#allocation27_spill] sm:$0xff] }
 0x449   :  { %2421 = vrcp.f32 %v1314_v61 }
 0x44e   :  { %v2412_v30 = vpop.eup %2411 }
 0x44f   :  { %v2414_v31 = vpop.eup %2413  ;;  %v1334_v32 = vmul.f32 %v2412_v30, %v2406_v27  ;;  %v3720_v27 = vld [vmem:[#allocation6_spill] sm:$0xff] }
 0x450   :  { %v2416_v52 = vpop.eup %2415 }
 0x451   :  { %v2418_v48 = vpop.eup %2417  ;;  %v1332_v54 = vmul.f32 %v2416_v52, %v3251_v21 }
 0x452   :  { %v1335_v19 = vmul.f32 %v2418_v48, %v2414_v31  ;;  %v2420_v0 = vpop.eup %2419  ;;  %v3722_v48 = vld [vmem:[#allocation26_spill] sm:$0xff] }
 0x453   :  { %v3381_v53 = vadd.f32 %v1334_v32, %v1332_v54  ;;  %v1333_v2 = vmul.f32 %v2420_v0, %v3255_v24  ;;  %v2422_v49 = vpop.eup %2421  ;;  %v3392_v24 = vld [vmem:[%s3651_s3 + $0x8] ss:$16 sps:$4 sm:$0xff]   ;;  %v3723_v54 = vld [vmem:[#allocation43_spill] sm:$0xff] }
 0x455   :  { %2423 = vtanh.f32 %v3381_v53  ;;  %v3385_v25 = vadd.f32 %v1335_v19, %v1333_v2 }
 0x456   :  { %2425 = vrcp.f32 %v1317_v58 }
 0x457   :  { %2427 = vtanh.f32 %v3385_v25 }
 0x45f   :  { %v2424_v12 = vpop.eup %2423 }
 0x460   :  { %v2426_v57 = vpop.eup %2425  ;;  %v1340_v21 = vmul.f32 %v2424_v12, %v2422_v49  ;;  %v3724_v49 = vld [vmem:[#allocation28_spill] sm:$0xff] }
 0x461   :  { %v2428_v63 = vpop.eup %2427 }
 0x462   :  { %v1341_v3 = vmul.f32 %v2428_v63, %v2426_v57  ;;  %v3725_v57 = vld [vmem:[#allocation44_spill] sm:$0xff] }
 0x464   :  { %v1351_v20 = vpack.c.bf16 %v1341_v3, %v1340_v21 }
 0x466   :  { %1385 = vmatmul.mubr.bf16.vlgmr.msra.gmra.mrb[40].mxu0 %v1351_v20  ;;  %1428 = vmatmul.mubr.bf16.vlgmr.msra.gmra.mrb[56].mxu1 %v1351_v20 }
 0x467   :  { %1505 = vmatpush1.bf16.msra.mxu0 %v3261_v1  ;;  %1548 = vmatpush1.bf16.msra.mxu1 %v3392_v24 }
 0x468   :  { %1506 = vmatprep.subr.bf16.mxu0 %v3268_v33  ;;  %1549 = vmatprep.subr.bf16.mxu1 %v3399_v36 }
 0x469   :  { %1536 = vmatprep.mubr.bf16.mxu0 %v3703_v9  ;;  %1579 = vmatprep.mubr.bf16.mxu1 %v3703_v9 }
 0x46b   :  { %1507 = vmatpush1.bf16.msra.mxu0 %v3277_v14  ;;  %1550 = vmatpush1.bf16.msra.mxu1 %v3408_v8 }
 0x46c   :  { %1508 = vmatprep.subr.bf16.mxu0 %v3284_v34  ;;  %1551 = vmatprep.subr.bf16.mxu1 %v3415_v60 }
 0x46f   :  { %1509 = vmatpush1.bf16.msra.mxu0 %v3291_v35  ;;  %1552 = vmatpush1.bf16.msra.mxu1 %v3422_v10 }
 0x470   :  { %1510 = vmatprep.subr.bf16.mxu0 %v3298_v37  ;;  %1553 = vmatprep.subr.bf16.mxu1 %v3429_v13 }
 0x473   :  { %1511 = vmatpush1.bf16.msra.mxu0 %v3305_v38  ;;  %1554 = vmatpush1.bf16.msra.mxu1 %v3436_v56 }
 0x474   :  { %1512 = vmatprep.subr.bf16.mxu0 %v3312_v39  ;;  %1555 = vmatprep.subr.bf16.mxu1 %v3443_v59 }
 0x477   :  { %1513 = vmatpush1.bf16.msra.mxu0 %v3319_v40  ;;  %1556 = vmatpush1.bf16.msra.mxu1 %v3450_v55 }
 0x478   :  { %1514 = vmatprep.subr.bf16.mxu0 %v3326_v41  ;;  %1557 = vmatprep.subr.bf16.mxu1 %v3457_v4 }
 0x47b   :  { %1515 = vmatpush1.bf16.msra.mxu0 %v3333_v42  ;;  %1558 = vmatpush1.bf16.msra.mxu1 %v3464_v5 }
 0x47c   :  { %1516 = vmatprep.subr.bf16.mxu0 %v3340_v43  ;;  %1559 = vmatprep.subr.bf16.mxu1 %v3471_v62 }
 0x47f   :  { %1517 = vmatpush1.bf16.msra.mxu0 %v3347_v44  ;;  %1560 = vmatpush1.bf16.msra.mxu1 %v3478_v7 }
 0x480   :  { %1518 = vmatprep.subr.bf16.mxu0 %v3354_v45  ;;  %1561 = vmatprep.subr.bf16.mxu1 %v3485_v50 }
 0x483   :  { %1519 = vmatpush1.bf16.msra.mxu0 %v3361_v46  ;;  %1562 = vmatpush1.bf16.msra.mxu1 %v3492_v6 }
 0x484   :  { %1656 = vmatprep.subr.bf16.mxu0 %v3238_v15  ;;  %1699 = vmatprep.subr.bf16.mxu1 %v3369_v47 }
 0x539   :  { %v1386_v11 = vpop.f32.mrb[40].mxu0  ;;  %v1429_v51 = vpop.f32.mrb[56].mxu1 }
 0x53a   :  { %v1438_v17 = vadd.f32 %v1386_v11, %v3718_v16  ;;  %v1440_v22 = vadd.f32 %v1429_v51, %v3719_v18  ;;  %v1388_v23 = vpop.f32.mrb[41].mxu0  ;;  %v1431_v26 = vpop.f32.mrb[57].mxu1 }
 0x53b   :  { %v1439_v28 = vadd.f32 %v1388_v23, %v3720_v27  ;;  %v1441_v30 = vadd.f32 %v1431_v26, %v3721_v29  ;;  %v1390_v31 = vpop.f32.mrb[42].mxu0  ;;  %v1433_v32 = vpop.f32.mrb[58].mxu1 }
 0x53c   :  { %v2156_v52 = vmul.f32 -1.442695, %v1438_v17  ;;  %v1442_v61 = vadd.f32 %v1390_v31, %v3722_v48  ;;  %v1444_v19 = vadd.f32 %v1433_v32, %v3723_v54  ;;  %v1392_v0 = vpop.f32.mrb[43].mxu0  ;;  %v1435_v58 = vpop.f32.mrb[59].mxu1  ;;  %v2158_v20 = vmul.f32 -1.442695, %v1440_v22 }
 0x53d   :  { %v2157_v2 = vmul.f32 -1.442695, %v1439_v28  ;;  %v1443_v12 = vadd.f32 %v1392_v0, %v3724_v49  ;;  %v1445_v63 = vadd.f32 %v1435_v58, %v3725_v57 }
 0x53e   :  { %2429 = vpow2.f32 %v2156_v52  ;;  %v2159_v21 = vmul.f32 -1.442695, %v1442_v61  ;;  %v2161_v11 = vmul.f32 -1.442695, %v1444_v19 }
 0x53f   :  { %v2160_v3 = vmul.f32 -1.442695, %v1443_v12  ;;  %2431 = vpow2.f32 %v2157_v2 }
 0x540   :  { %2433 = vpow2.f32 %v2159_v21 }
 0x541   :  { %2435 = vpow2.f32 %v2160_v3 }
 0x542   :  { %2437 = vtanh.f32 %v1441_v30 }
 0x543   :  { %2439 = vpow2.f32 %v2158_v20 }
 0x544   :  { %2441 = vpow2.f32 %v2161_v11 }
 0x548   :  { %v2430_v51 = vpop.eup %2429 }
 0x549   :  { %v1464_v16 = vadd.f32 1.0, %v2430_v51  ;;  %v2432_v17 = vpop.eup %2431 }
 0x54a   :  { %v2434_v18 = vpop.eup %2433  ;;  %v1465_v23 = vadd.f32 1.0, %v2432_v17  ;;  %v3726_v17 = vld [vmem:[#allocation7_spill] sm:$0xff] }
 0x54b   :  { %2443 = vrcp.f32 %v1464_v16  ;;  %v1467_v26 = vadd.f32 1.0, %v2434_v18  ;;  %v2436_v27 = vpop.eup %2435 }
 0x54c   :  { %2445 = vtanh.f32 %v1445_v63  ;;  %v1468_v28 = vadd.f32 1.0, %v2436_v27  ;;  %v2438_v29 = vpop.eup %2437 }
 0x54d   :  { %2447 = vrcp.f32 %v1465_v23  ;;  %v2440_v31 = vpop.eup %2439  ;;  %v3727_v23 = vld [vmem:[#allocation29_spill] sm:$0xff] }
 0x54e   :  { %2449 = vrcp.f32 %v1467_v26  ;;  %v2442_v22 = vpop.eup %2441  ;;  %v1466_v54 = vadd.f32 1.0, %v2440_v31 }
 0x54f   :  { %2451 = vrcp.f32 %v1468_v28  ;;  %v1469_v49 = vadd.f32 1.0, %v2442_v22  ;;  %v3729_v22 = vld [vmem:[#allocation31_spill] sm:$0xff] }
 0x550   :  { %2453 = vrcp.f32 %v1466_v54 }
 0x555   :  { %v2444_v32 = vpop.eup %2443 }
 0x556   :  { %v2446_v52 = vpop.eup %2445  ;;  %v1486_v30 = vmul.f32 %v2444_v32, %v2438_v29  ;;  %v3728_v29 = vld [vmem:[#allocation8_spill] sm:$0xff] }
 0x557   :  { %v2448_v48 = vpop.eup %2447 }
 0x558   :  { %v2450_v61 = vpop.eup %2449  ;;  %v1484_v19 = vmul.f32 %v2448_v48, %v3381_v53 }
 0x559   :  { %v1487_v0 = vmul.f32 %v2450_v61, %v2446_v52  ;;  %v2452_v58 = vpop.eup %2451  ;;  %v3730_v61 = vld [vmem:[#allocation30_spill] sm:$0xff] }
 0x55a   :  { %v3506_v2 = vadd.f32 %v1486_v30, %v1484_v19  ;;  %v1485_v12 = vmul.f32 %v2452_v58, %v3385_v25  ;;  %v2454_v63 = vpop.eup %2453 }
 0x55c   :  { %2455 = vtanh.f32 %v3506_v2  ;;  %v3510_v57 = vadd.f32 %v1487_v0, %v1485_v12 }
 0x55d   :  { %2457 = vrcp.f32 %v1469_v49  ;;  %v3732_v49 = vld [vmem:[#allocation32_spill] sm:$0xff] }
 0x55e   :  { %2459 = vtanh.f32 %v3510_v57 }
 0x566   :  { %v2456_v21 = vpop.eup %2455 }
 0x567   :  { %v2458_v3 = vpop.eup %2457  ;;  %v1492_v53 = vmul.f32 %v2456_v21, %v2454_v63  ;;  %v3733_v63 = vld [vmem:[#allocation46_spill] sm:$0xff] }
 0x568   :  { %v2460_v20 = vpop.eup %2459 }
 0x569   :  { %v1493_v11 = vmul.f32 %v2460_v20, %v2458_v3 }
 0x56b   :  { %v1503_v51 = vpack.c.bf16 %v1493_v11, %v1492_v53 }
 0x56d   :  { %1537 = vmatmul.mubr.bf16.vlgmr.msra.gmra.mrb[44].mxu0 %v1503_v51  ;;  %1580 = vmatmul.mubr.bf16.vlgmr.msra.gmra.mrb[60].mxu1 %v1503_v51 }
 0x56e   :  { %1657 = vmatpush1.bf16.msra.mxu0 %v3261_v1  ;;  %1700 = vmatpush1.bf16.msra.mxu1 %v3392_v24 }
 0x56f   :  { %1658 = vmatprep.subr.bf16.mxu0 %v3268_v33  ;;  %1701 = vmatprep.subr.bf16.mxu1 %v3399_v36 }
 0x570   :  { %1688 = vmatprep.mubr.bf16.mxu0 %v3703_v9  ;;  %1731 = vmatprep.mubr.bf16.mxu1 %v3703_v9 }
 0x572   :  { %1659 = vmatpush1.bf16.msra.mxu0 %v3277_v14  ;;  %1702 = vmatpush1.bf16.msra.mxu1 %v3408_v8 }
 0x573   :  { %1660 = vmatprep.subr.bf16.mxu0 %v3284_v34  ;;  %1703 = vmatprep.subr.bf16.mxu1 %v3415_v60 }
 0x576   :  { %1661 = vmatpush1.bf16.msra.mxu0 %v3291_v35  ;;  %1704 = vmatpush1.bf16.msra.mxu1 %v3422_v10 }
 0x577   :  { %1662 = vmatprep.subr.bf16.mxu0 %v3298_v37  ;;  %1705 = vmatprep.subr.bf16.mxu1 %v3429_v13 }
 0x57a   :  { %1663 = vmatpush1.bf16.msra.mxu0 %v3305_v38  ;;  %1706 = vmatpush1.bf16.msra.mxu1 %v3436_v56 }
 0x57b   :  { %1664 = vmatprep.subr.bf16.mxu0 %v3312_v39  ;;  %1707 = vmatprep.subr.bf16.mxu1 %v3443_v59 }
 0x57e   :  { %1665 = vmatpush1.bf16.msra.mxu0 %v3319_v40  ;;  %1708 = vmatpush1.bf16.msra.mxu1 %v3450_v55 }
 0x57f   :  { %1666 = vmatprep.subr.bf16.mxu0 %v3326_v41  ;;  %1709 = vmatprep.subr.bf16.mxu1 %v3457_v4 }
 0x582   :  { %1667 = vmatpush1.bf16.msra.mxu0 %v3333_v42  ;;  %1710 = vmatpush1.bf16.msra.mxu1 %v3464_v5 }
 0x583   :  { %1668 = vmatprep.subr.bf16.mxu0 %v3340_v43  ;;  %1711 = vmatprep.subr.bf16.mxu1 %v3471_v62 }
 0x586   :  { %1669 = vmatpush1.bf16.msra.mxu0 %v3347_v44  ;;  %1712 = vmatpush1.bf16.msra.mxu1 %v3478_v7 }
 0x587   :  { %1670 = vmatprep.subr.bf16.mxu0 %v3354_v45  ;;  %1713 = vmatprep.subr.bf16.mxu1 %v3485_v50 }
 0x58a   :  { %1671 = vmatpush1.bf16.msra.mxu0 %v3361_v46  ;;  %1714 = vmatpush1.bf16.msra.mxu1 %v3492_v6 }
 0x58b   :  { %1808 = vmatprep.subr.bf16.mxu0 %v3238_v15  ;;  %1851 = vmatprep.subr.bf16.mxu1 %v3369_v47  ;;  %v3731_v15 = vld [vmem:[#allocation45_spill] sm:$0xff] }
 0x640   :  { %v1538_v25 = vpop.f32.mrb[44].mxu0  ;;  %v1581_v16 = vpop.f32.mrb[60].mxu1 }
 0x641   :  { %v1590_v18 = vadd.f32 %v1538_v25, %v3726_v17  ;;  %v1592_v26 = vadd.f32 %v1581_v16, %v3727_v23  ;;  %v1540_v27 = vpop.f32.mrb[45].mxu0  ;;  %v1583_v28 = vpop.f32.mrb[61].mxu1 }
 0x642   :  { %v1591_v31 = vadd.f32 %v1540_v27, %v3728_v29  ;;  %v1593_v32 = vadd.f32 %v1583_v28, %v3729_v22  ;;  %v1542_v52 = vpop.f32.mrb[46].mxu0  ;;  %v1585_v30 = vpop.f32.mrb[62].mxu1 }
 0x643   :  { %v2162_v48 = vmul.f32 -1.442695, %v1590_v18  ;;  %v1594_v54 = vadd.f32 %v1542_v52, %v3730_v61  ;;  %v1596_v19 = vadd.f32 %v1585_v30, %v3731_v15  ;;  %v1544_v47 = vpop.f32.mrb[47].mxu0  ;;  %v1587_v0 = vpop.f32.mrb[63].mxu1  ;;  %v2164_v53 = vmul.f32 -1.442695, %v1592_v26 }
 0x644   :  { %v2163_v58 = vmul.f32 -1.442695, %v1591_v31  ;;  %v1595_v12 = vadd.f32 %v1544_v47, %v3732_v49  ;;  %v1597_v21 = vadd.f32 %v1587_v0, %v3733_v63 }
 0x645   :  { %2461 = vpow2.f32 %v2162_v48  ;;  %v2165_v3 = vmul.f32 -1.442695, %v1594_v54  ;;  %v2167_v11 = vmul.f32 -1.442695, %v1596_v19 }
 0x646   :  { %v2166_v20 = vmul.f32 -1.442695, %v1595_v12  ;;  %2463 = vpow2.f32 %v2163_v58 }
 0x647   :  { %2465 = vpow2.f32 %v2165_v3 }
 0x648   :  { %2467 = vpow2.f32 %v2166_v20 }
 0x649   :  { %2469 = vtanh.f32 %v1593_v32 }
 0x64a   :  { %2471 = vpow2.f32 %v2164_v53 }
 0x64b   :  { %2473 = vpow2.f32 %v2167_v11 }
 0x64f   :  { %v2462_v51 = vpop.eup %2461 }
 0x650   :  { %v1616_v25 = vadd.f32 1.0, %v2462_v51  ;;  %v2464_v16 = vpop.eup %2463 }
 0x651   :  { %v2466_v17 = vpop.eup %2465  ;;  %v1617_v18 = vadd.f32 1.0, %v2464_v16 }
 0x652   :  { %2475 = vrcp.f32 %v1616_v25  ;;  %v1619_v23 = vadd.f32 1.0, %v2466_v17  ;;  %v2468_v27 = vpop.eup %2467 }
 0x653   :  { %2477 = vtanh.f32 %v1597_v21  ;;  %v1620_v28 = vadd.f32 1.0, %v2468_v27  ;;  %v2470_v29 = vpop.eup %2469 }
 0x654   :  { %2479 = vrcp.f32 %v1617_v18  ;;  %v2472_v31 = vpop.eup %2471 }
 0x655   :  { %2481 = vrcp.f32 %v1619_v23  ;;  %v2474_v26 = vpop.eup %2473  ;;  %v1618_v61 = vadd.f32 1.0, %v2472_v31 }
 0x656   :  { %2483 = vrcp.f32 %v1620_v28  ;;  %v1621_v0 = vadd.f32 1.0, %v2474_v26 }
 0x657   :  { %2485 = vrcp.f32 %v1618_v61 }
 0x65c   :  { %v2476_v22 = vpop.eup %2475 }
 0x65d   :  { %v2478_v52 = vpop.eup %2477  ;;  %v1638_v32 = vmul.f32 %v2476_v22, %v2470_v29 }
 0x65e   :  { %v2480_v30 = vpop.eup %2479 }
 0x65f   :  { %v2482_v48 = vpop.eup %2481  ;;  %v1636_v54 = vmul.f32 %v2480_v30, %v3506_v2 }
 0x660   :  { %v1639_v15 = vmul.f32 %v2482_v48, %v2478_v52  ;;  %v2484_v19 = vpop.eup %2483 }
 0x661   :  { %v3556_v47 = vadd.f32 %v1638_v32, %v1636_v54  ;;  %v1637_v58 = vmul.f32 %v2484_v19, %v3510_v57  ;;  %v2486_v12 = vpop.eup %2485 }
 0x663   :  { %2487 = vtanh.f32 %v3556_v47  ;;  %v3560_v49 = vadd.f32 %v1639_v15, %v1637_v58 }
 0x664   :  { %2489 = vrcp.f32 %v1621_v0 }
 0x665   :  { %2491 = vtanh.f32 %v3560_v49 }
 0x66d   :  { %v2488_v63 = vpop.eup %2487 }
 0x66e   :  { %v2490_v21 = vpop.eup %2489  ;;  %v1644_v2 = vmul.f32 %v2488_v63, %v2486_v12 }
 0x66f   :  { %v2492_v3 = vpop.eup %2491 }
 0x670   :  { %v1645_v20 = vmul.f32 %v2492_v3, %v2490_v21 }
 0x672   :  { %v1655_v53 = vpack.c.bf16 %v1645_v20, %v1644_v2  ;;  %v2591_v20 = vmov 0.0  }
 0x674   :  { %1689 = vmatmul.mubr.bf16.vlgmr.msra.gmra.mrb[48].mxu0 %v1655_v53  ;;  %1732 = vmatmul.mubr.bf16.vlgmr.msra.gmra.mrb[64].mxu1 %v1655_v53  ;;  %v2294_v53 = vld [vmem:[%s3653_s5 + $0x8] sm:$0xff]  }
 0x675   :  { %1809 = vmatpush1.bf16.msra.mxu0 %v3261_v1  ;;  %1852 = vmatpush1.bf16.msra.mxu1 %v3392_v24  ;;  %v3738_v24 = vld [vmem:[#allocation34_spill] sm:$0xff] }
 0x676   :  { %1810 = vmatprep.subr.bf16.mxu0 %v3268_v33  ;;  %1853 = vmatprep.subr.bf16.mxu1 %v3399_v36  ;;  %v3734_v33 = vld [vmem:[#allocation9_spill] sm:$0xff] }
 0x677   :  { %1840 = vmatprep.mubr.bf16.mxu0 %v3703_v9  ;;  %1883 = vmatprep.mubr.bf16.mxu1 %v3703_v9 }
 0x679   :  { %1811 = vmatpush1.bf16.msra.mxu0 %v3277_v14  ;;  %1854 = vmatpush1.bf16.msra.mxu1 %v3408_v8 }
 0x67a   :  { %1812 = vmatprep.subr.bf16.mxu0 %v3284_v34  ;;  %1855 = vmatprep.subr.bf16.mxu1 %v3415_v60  ;;  %v3735_v34 = vld [vmem:[#allocation33_spill] sm:$0xff] }
 0x67d   :  { %1813 = vmatpush1.bf16.msra.mxu0 %v3291_v35  ;;  %1856 = vmatpush1.bf16.msra.mxu1 %v3422_v10 }
 0x67e   :  { %1814 = vmatprep.subr.bf16.mxu0 %v3298_v37  ;;  %1857 = vmatprep.subr.bf16.mxu1 %v3429_v13 }
 0x681   :  { %1815 = vmatpush1.bf16.msra.mxu0 %v3305_v38  ;;  %1858 = vmatpush1.bf16.msra.mxu1 %v3436_v56  ;;  %v3740_v56 = vld [vmem:[#allocation36_spill] sm:$0xff] }
 0x682   :  { %1816 = vmatprep.subr.bf16.mxu0 %v3312_v39  ;;  %1859 = vmatprep.subr.bf16.mxu1 %v3443_v59  ;;  %v3736_v39 = vld [vmem:[#allocation11_spill] sm:$0xff] }
 0x685   :  { %1817 = vmatpush1.bf16.msra.mxu0 %v3319_v40  ;;  %1860 = vmatpush1.bf16.msra.mxu1 %v3450_v55  ;;  %v3741_v55 = vld [vmem:[#allocation48_spill] sm:$0xff] }
 0x686   :  { %1818 = vmatprep.subr.bf16.mxu0 %v3326_v41  ;;  %1861 = vmatprep.subr.bf16.mxu1 %v3457_v4  ;;  %v3737_v41 = vld [vmem:[#allocation35_spill] sm:$0xff] }
 0x689   :  { %1819 = vmatpush1.bf16.msra.mxu0 %v3333_v42  ;;  %1862 = vmatpush1.bf16.msra.mxu1 %v3464_v5 }
 0x68a   :  { %1820 = vmatprep.subr.bf16.mxu0 %v3340_v43  ;;  %1863 = vmatprep.subr.bf16.mxu1 %v3471_v62 }
 0x68d   :  { %1821 = vmatpush1.bf16.msra.mxu0 %v3347_v44  ;;  %1864 = vmatpush1.bf16.msra.mxu1 %v3478_v7 }
 0x68e   :  { %1822 = vmatprep.subr.bf16.mxu0 %v3354_v45  ;;  %1865 = vmatprep.subr.bf16.mxu1 %v3485_v50 }
 0x691   :  { %1823 = vmatpush1.bf16.msra.mxu0 %v3361_v46  ;;  %1866 = vmatpush1.bf16.msra.mxu1 %v3492_v6  ;;  %v3739_v46 = vld [vmem:[#allocation47_spill] sm:$0xff] }
 0x692   :  { %2197 = vmatprep.subr.bf16.mxu0 %v2591_v20 }
 0x747   :  { %v1690_v9 = vpop.f32.mrb[48].mxu0  ;;  %v1733_v1 = vpop.f32.mrb[64].mxu1 }
 0x748   :  { %v1742_v14 = vadd.f32 %v1690_v9, %v3734_v33  ;;  %v1744_v35 = vadd.f32 %v1733_v1, %v3735_v34  ;;  %v1692_v37 = vpop.f32.mrb[49].mxu0  ;;  %v1735_v38 = vpop.f32.mrb[65].mxu1  ;;  %v2295_v9 = vld [vmem:[%s3653_s5 + $0x10] sm:$0xff]   ;;  %v2296_v1 = vld [vmem:[%s3653_s5 + $0x18] sm:$0xff]   ;;  %v2297_v33 = vld [vmem:[%s3653_s5 + $0x20] sm:$0xff]  }
 0x749   :  { %v1743_v40 = vadd.f32 %v1692_v37, %v3736_v39  ;;  %v1745_v42 = vadd.f32 %v1735_v38, %v3737_v41  ;;  %v1694_v43 = vpop.f32.mrb[50].mxu0  ;;  %v1737_v44 = vpop.f32.mrb[66].mxu1  ;;  %v2299_v34 = vld [vmem:[%s3653_s5 + $0x30] sm:$0xff]   ;;  %v3742_v39 = vld [vmem:[#allocation13_spill] sm:$0xff] }
 0x74a   :  { %v2168_v45 = vmul.f32 -1.442695, %v1742_v14  ;;  %v1746_v36 = vadd.f32 %v1694_v43, %v3738_v24  ;;  %v1748_v8 = vadd.f32 %v1737_v44, %v3739_v46  ;;  %v1696_v60 = vpop.f32.mrb[51].mxu0  ;;  %v1739_v10 = vpop.f32.mrb[67].mxu1  ;;  %v2170_v7 = vmul.f32 -1.442695, %v1744_v35 }
 0x74b   :  { %v2169_v13 = vmul.f32 -1.442695, %v1743_v40  ;;  %v1747_v59 = vadd.f32 %v1696_v60, %v3740_v56  ;;  %v1749_v4 = vadd.f32 %v1739_v10, %v3741_v55  ;;  %v2298_v14 = vld [vmem:[%s3653_s5 + $0x28] sm:$0xff]   ;;  %v2300_v35 = vld [vmem:[%s3653_s5 + $0x38] sm:$0xff]   ;;  %v3743_v41 = vld [vmem:[#allocation37_spill] sm:$0xff] }
 0x74c   :  { %2493 = vpow2.f32 %v2168_v45  ;;  %v2171_v5 = vmul.f32 -1.442695, %v1746_v36  ;;  %v2173_v50 = vmul.f32 -1.442695, %v1748_v8  ;;  %v3744_v45 = vld [vmem:[#allocation15_spill] sm:$0xff] }
 0x74d   :  { %v2172_v62 = vmul.f32 -1.442695, %v1747_v59  ;;  %2495 = vpow2.f32 %v2169_v13  ;;  %v3745_v36 = vld [vmem:[#allocation39_spill] sm:$0xff]  ;;  %v3746_v13 = vld [vmem:[#allocation38_spill] sm:$0xff]  ;;  %v3747_v59 = vld [vmem:[#allocation49_spill] sm:$0xff] }
 0x74e   :  { %2497 = vpow2.f32 %v2171_v5 }
 0x74f   :  { %2499 = vpow2.f32 %v2172_v62 }
 0x750   :  { %2501 = vtanh.f32 %v1745_v42 }
 0x751   :  { %2503 = vpow2.f32 %v2170_v7  ;;  %v3748_v7 = vld [vmem:[#allocation40_spill] sm:$0xff] }
 0x752   :  { %2505 = vpow2.f32 %v2173_v50 }
 0x756   :  { %v2494_v6 = vpop.eup %2493 }
 0x757   :  { %v1768_v57 = vadd.f32 1.0, %v2494_v6  ;;  %v2496_v11 = vpop.eup %2495  ;;  %v3749_v6 = vld [vmem:[#allocation50_spill] sm:$0xff] }
 0x758   :  { %v2498_v51 = vpop.eup %2497  ;;  %v1769_v25 = vadd.f32 1.0, %v2496_v11 }
 0x759   :  { %2507 = vrcp.f32 %v1768_v57  ;;  %v1771_v16 = vadd.f32 1.0, %v2498_v51  ;;  %v2500_v17 = vpop.eup %2499 }
 0x75a   :  { %2509 = vtanh.f32 %v1749_v4  ;;  %v1772_v18 = vadd.f32 1.0, %v2500_v17  ;;  %v2502_v23 = vpop.eup %2501 }
 0x75b   :  { %2511 = vrcp.f32 %v1769_v25  ;;  %v2504_v27 = vpop.eup %2503 }
 0x75c   :  { %2513 = vrcp.f32 %v1771_v16  ;;  %v2506_v28 = vpop.eup %2505  ;;  %v1770_v32 = vadd.f32 1.0, %v2504_v27 }
 0x75d   :  { %2515 = vrcp.f32 %v1772_v18  ;;  %v1773_v15 = vadd.f32 1.0, %v2506_v28 }
 0x75e   :  { %2517 = vrcp.f32 %v1770_v32 }
 0x763   :  { %v2508_v29 = vpop.eup %2507 }
 0x764   :  { %v2510_v31 = vpop.eup %2509  ;;  %v1790_v26 = vmul.f32 %v2508_v29, %v2502_v23 }
 0x765   :  { %v2512_v22 = vpop.eup %2511 }
 0x766   :  { %v2514_v52 = vpop.eup %2513  ;;  %v1788_v30 = vmul.f32 %v2512_v22, %v3556_v47 }
 0x767   :  { %v1791_v48 = vmul.f32 %v2514_v52, %v2510_v31  ;;  %v2516_v61 = vpop.eup %2515 }
 0x768   :  { %v3604_v54 = vadd.f32 %v1790_v26, %v1788_v30  ;;  %v1789_v19 = vmul.f32 %v2516_v61, %v3560_v49  ;;  %v2518_v58 = vpop.eup %2517  ;;  %v2293_v49 = vld [vmem:[%s3653_s5] sm:$0xff]  }
 0x76a   :  { %2519 = vtanh.f32 %v3604_v54  ;;  %v3608_v0 = vadd.f32 %v1791_v48, %v1789_v19 }
 0x76b   :  { %2521 = vrcp.f32 %v1773_v15 }
 0x76c   :  { %2523 = vtanh.f32 %v3608_v0 }
 0x774   :  { %v2520_v12 = vpop.eup %2519 }
 0x775   :  { %v2522_v63 = vpop.eup %2521  ;;  %v1796_v47 = vmul.f32 %v2520_v12, %v2518_v58 }
 0x776   :  { %v2524_v21 = vpop.eup %2523 }
 0x777   :  { %v1797_v3 = vmul.f32 %v2524_v21, %v2522_v63 }
 0x779   :  { %v1807_v2 = vpack.c.bf16 %v1797_v3, %v1796_v47 }
 0x77b   :  { %1841 = vmatmul.mubr.bf16.vlgmr.msra.gmra.mrb[52].mxu0 %v1807_v2  ;;  %1884 = vmatmul.mubr.bf16.vlgmr.msra.gmra.mrb[68].mxu1 %v1807_v2 }
 0x77c   :  { %2198 = vmatpush3.bf16.msra.mxu0 %v2293_v49  ;;  %2213 = vmatprep.mubr.msk.bf16.mxu0 %vm2592_vm1, %v2591_v20 }
 0x77d   :  { %2199 = vmatprep.subr.bf16.mxu0 %v2591_v20 }
 0x780   :  { %2200 = vmatpush3.bf16.msra.mxu0 %v2294_v53 }
 0x781   :  { %2201 = vmatprep.subr.bf16.mxu0 %v2591_v20 }
 0x784   :  { %2202 = vmatpush3.bf16.msra.mxu0 %v2295_v9 }
 0x785   :  { %2203 = vmatprep.subr.bf16.mxu0 %v2591_v20 }
 0x788   :  { %2204 = vmatpush3.bf16.msra.mxu0 %v2296_v1 }
 0x789   :  { %2205 = vmatprep.subr.bf16.mxu0 %v2591_v20 }
 0x78c   :  { %2206 = vmatpush3.bf16.msra.mxu0 %v2297_v33 }
 0x78d   :  { %2207 = vmatprep.subr.bf16.mxu0 %v2591_v20 }
 0x790   :  { %2208 = vmatpush3.bf16.msra.mxu0 %v2298_v14 }
 0x791   :  { %2209 = vmatprep.subr.bf16.mxu0 %v2591_v20 }
 0x794   :  { %2210 = vmatpush3.bf16.msra.mxu0 %v2299_v34 }
 0x795   :  { %2211 = vmatprep.subr.bf16.mxu0 %v2591_v20 }
 0x798   :  { %2212 = vmatpush3.bf16.msra.mxu0 %v2300_v35 }
 0x84e   :  { %v1842_v37 = vpop.f32.mrb[52].mxu0  ;;  %v1885_v38 = vpop.f32.mrb[68].mxu1 }
 0x84f   :  { %v1894_v40 = vadd.f32 %v1842_v37, %v3742_v39  ;;  %v1896_v42 = vadd.f32 %v1885_v38, %v3743_v41  ;;  %v1844_v43 = vpop.f32.mrb[53].mxu0  ;;  %v1887_v44 = vpop.f32.mrb[69].mxu1 }
 0x850   :  { %v1895_v24 = vadd.f32 %v1844_v43, %v3744_v45  ;;  %v1897_v46 = vadd.f32 %v1887_v44, %v3745_v36  ;;  %v1846_v8 = vpop.f32.mrb[54].mxu0  ;;  %v1889_v60 = vpop.f32.mrb[70].mxu1 }
 0x851   :  { %v2174_v10 = vmul.f32 -1.442695, %v1894_v40  ;;  %v1898_v56 = vadd.f32 %v1846_v8, %v3746_v13  ;;  %v1900_v55 = vadd.f32 %v1889_v60, %v3747_v59  ;;  %v1848_v4 = vpop.f32.mrb[55].mxu0  ;;  %v1891_v5 = vpop.f32.mrb[71].mxu1  ;;  %v2176_v25 = vmul.f32 -1.442695, %v1896_v42 }
 0x852   :  { %v2175_v62 = vmul.f32 -1.442695, %v1895_v24  ;;  %v1899_v50 = vadd.f32 %v1848_v4, %v3748_v7  ;;  %v1901_v57 = vadd.f32 %v1891_v5, %v3749_v6 }
 0x853   :  { %2525 = vpow2.f32 %v2174_v10  ;;  %v2177_v11 = vmul.f32 -1.442695, %v1898_v56  ;;  %v2179_v16 = vmul.f32 -1.442695, %v1900_v55 }
 0x854   :  { %v2178_v51 = vmul.f32 -1.442695, %v1899_v50  ;;  %2527 = vpow2.f32 %v2175_v62 }
 0x855   :  { %2529 = vpow2.f32 %v2177_v11 }
 0x856   :  { %2531 = vpow2.f32 %v2178_v51 }
 0x857   :  { %2533 = vtanh.f32 %v1897_v46 }
 0x858   :  { %2535 = vpow2.f32 %v2176_v25 }
 0x859   :  { %2537 = vpow2.f32 %v2179_v16 }
 0x85d   :  { %v2526_v17 = vpop.eup %2525 }
 0x85e   :  { %v1920_v18 = vadd.f32 1.0, %v2526_v17  ;;  %v2528_v23 = vpop.eup %2527 }
 0x85f   :  { %v2530_v27 = vpop.eup %2529  ;;  %v1921_v28 = vadd.f32 1.0, %v2528_v23 }
 0x860   :  { %2539 = vrcp.f32 %v1920_v18  ;;  %v1923_v29 = vadd.f32 1.0, %v2530_v27  ;;  %v2532_v31 = vpop.eup %2531 }
 0x861   :  { %2541 = vtanh.f32 %v1901_v57  ;;  %v1924_v26 = vadd.f32 1.0, %v2532_v31  ;;  %v2534_v22 = vpop.eup %2533 }
 0x862   :  { %2543 = vrcp.f32 %v1921_v28  ;;  %v2536_v52 = vpop.eup %2535 }
 0x863   :  { %2545 = vrcp.f32 %v1923_v29  ;;  %v2538_v32 = vpop.eup %2537  ;;  %v1922_v19 = vadd.f32 1.0, %v2536_v52 }
 0x864   :  { %2547 = vrcp.f32 %v1924_v26  ;;  %v1925_v3 = vadd.f32 1.0, %v2538_v32 }
 0x865   :  { %2549 = vrcp.f32 %v1922_v19 }
 0x86a   :  { %v2540_v30 = vpop.eup %2539 }
 0x86b   :  { %v2542_v48 = vpop.eup %2541  ;;  %v1942_v61 = vmul.f32 %v2540_v30, %v2534_v22 }
 0x86c   :  { %v2544_v15 = vpop.eup %2543 }
 0x86d   :  { %v2546_v58 = vpop.eup %2545  ;;  %v1940_v12 = vmul.f32 %v2544_v15, %v3604_v54 }
 0x86e   :  { %v1943_v63 = vmul.f32 %v2546_v58, %v2542_v48  ;;  %v2548_v21 = vpop.eup %2547 }
 0x86f   :  { %v1944_v47 = vadd.f32 %v1942_v61, %v1940_v12  ;;  %v1941_v2 = vmul.f32 %v2548_v21, %v3608_v0  ;;  %v2550_v20 = vpop.eup %2549 }
 0x871   :  { %2551 = vtanh.f32 %v1944_v47  ;;  %v1945_v49 = vadd.f32 %v1943_v63, %v1941_v2 }
 0x872   :  { %2553 = vrcp.f32 %v1925_v3 }
 0x873   :  { %2555 = vtanh.f32 %v1945_v49 }
 0x87b   :  { %v2552_v53 = vpop.eup %2551 }
 0x87c   :  { %v1948_v9 = vmul.f32 %v2552_v53, %v2550_v20  ;;  %v2554_v1 = vpop.eup %2553 }
 0x87d   :  { %v2556_v33 = vpop.eup %2555 }
 0x87e   :  { %v1957_v14 = vpack.c.bf16 %v1948_v9, %v1948_v9  ;;  %v1949_v34 = vmul.f32 %v2556_v33, %v2554_v1 }
 0x880   :  { %2214 = vmatmul.mubr.bf16.vlgmr.msra.gmra.mrb[56].mxu0 %v1957_v14 }
 0x953   :  { %v2056_v54 = vpop.f32.mrb[56].mxu0 }
 0x954   :  { %v2062_v35 = vmul.f32 %v2056_v54, %v1949_v34  ;;  %v2215_v37 = vpop.f32.mrb[57].mxu0 }
 0x955   :  { %v2059_v38 = vpop.f32.mrb[58].mxu0 }
 0x956   :  { %2063 = vst [vmem:[%s3654_s6] sm:$0xff] %v2062_v35  ;;  %v2216_v0 = vpop.f32.mrb[59].mxu0 }

</bundles_post_ra>
